<compile_context>
chip_gen: v6e
topology: v6e:2x2x1
jax: 0.10.0
libtpu: 0.0.40
codegen_flags: <defaults>
</compile_context>

<pallas_src>
import jax
import jax.numpy as jnp
from jax import lax
from jax.experimental import pallas as pl
from jax.experimental.pallas import tpu as pltpu


def _auvita_kernel(x_ref, mask_ref, wih_ref, whh_ref, b_ref,
                   wepi_ref, bepi_ref, b1_ref, y_ref, gx_ref):
    B, OUT = y_ref.shape
    TB = x_ref.shape[0]
    T = TB // B
    Hp = whh_ref.shape[0]

    # (1) Hoisted input projection for ALL timesteps + single bias broadcast.
    gx_ref[...] = (jnp.dot(x_ref[...], wih_ref[...],
                           preferred_element_type=jnp.float32) + b_ref[...])

    whh = whh_ref[...]
    h = jnp.zeros((B, Hp), jnp.float32)
    c = jnp.zeros((B, Hp), jnp.float32)

    # (2) Fully unrolled static-T recurrence; h/c stay in vregs.
    #     Each gate slice is a lane-aligned (B, Hp) slab (Hp is a multiple
    #     of 128), so slicing is pure vreg selection.
    for t in range(T):
        gates = gx_ref[t * B:(t + 1) * B, :] + jnp.dot(
            h, whh, preferred_element_type=jnp.float32)
        i = jax.nn.sigmoid(gates[:, 0 * Hp:1 * Hp])
        f = jax.nn.sigmoid(gates[:, 1 * Hp:2 * Hp])
        g = jnp.tanh(gates[:, 2 * Hp:3 * Hp])
        o = jax.nn.sigmoid(gates[:, 3 * Hp:4 * Hp])
        c = f * c + i * g
        h = o * jnp.tanh(c)

    # pad_packed_sequence zero-pads: the last-timestep row is nonzero only for
    # full-length sequences (wrapper guarantees max(lengths) == T).
    h_last = h * mask_ref[...]

    # (3) Fused epilogue: one matmul against [w1 | wa | wb].
    epi = jnp.dot(h_last, wepi_ref[...],
                  preferred_element_type=jnp.float32) + bepi_ref[...]
    hw1 = epi[:, 0:OUT]                       # h_last @ w1.T (bias added later)
    alpha = jnp.tanh(epi[:, OUT:OUT + 1])     # Tanh(Linear(H->1))
    z = epi[:, OUT + 1:OUT + 2]
    beta = z - jnp.tanh(z)                    # Tanhshrink(Linear(H->1))
    # TODO(synk): nn.Dropout(p=0.2) is identity in eval mode; training-mode
    # stochastic dropout would need pltpu.prng_seed/prng_random_bits.
    y_ref[...] = alpha * beta * hw1 + b1_ref[...]


def auvita_subnet(x, lengths, params, *, lane=128):
    """x: (B, T, IN) float32 (batch_first, like the PyTorch module).

    Requires max(lengths) == T (the padded length), as produced by
    pack_padded_sequence / pad_packed_sequence in the PyTorch forward.
    """
    B, T, IN = x.shape
    H = params["weight_hh"].shape[1]
    OUT = params["w1"].shape[0]
    Hp = ((H + lane - 1) // lane) * lane      # lane-dense padded hidden size

    def pad_gate_cols(wt):                    # (rows, 4H) -> (rows, 4*Hp)
        r = wt.shape[0]
        return jnp.pad(wt.reshape(r, 4, H),
                       ((0, 0), (0, 0), (0, Hp - H))).reshape(r, 4 * Hp)

    f32 = jnp.float32
    wih = pad_gate_cols(params["weight_ih"].T.astype(f32))            # (IN, 4Hp)
    whh = jnp.pad(pad_gate_cols(params["weight_hh"].T.astype(f32)),
                  ((0, Hp - H), (0, 0)))                               # (Hp, 4Hp)
    b = pad_gate_cols((params["bias_ih"]
                       + params["bias_hh"]).astype(f32).reshape(1, 4 * H))

    wepi = jnp.pad(jnp.concatenate(
        [params["w1"].T, params["wa"].T, params["wb"].T], axis=1).astype(f32),
        ((0, Hp - H), (0, 0)))                                         # (Hp, OUT+2)
    bepi = jnp.concatenate(
        [jnp.zeros((OUT,), f32), params["ba"].astype(f32),
         params["bb"].astype(f32)]).reshape(1, OUT + 2)
    b1 = params["b1"].astype(f32).reshape(1, OUT)

    # Time-major, flattened so the kernel reads timestep t as a static
    # sublane-aligned row slice [t*B:(t+1)*B].
    x_tm = jnp.transpose(x, (1, 0, 2)).reshape(T * B, IN).astype(f32)
    mask = (lengths.reshape(B, 1) >= T).astype(f32)                    # (B, 1)

    flops = 2 * T * B * IN * 4 * Hp + T * 2 * B * Hp * 4 * Hp \
        + 2 * B * Hp * (OUT + 2)
    transcendentals = T * 5 * B * Hp + 3 * B
    bytes_accessed = 4 * (T * B * IN + B + IN * 4 * Hp + Hp * 4 * Hp
                          + 4 * Hp + Hp * (OUT + 2) + (OUT + 2) + OUT
                          + B * OUT)

    return pl.pallas_call(
        _auvita_kernel,
        out_shape=jax.ShapeDtypeStruct((B, OUT), f32),
        scratch_shapes=[pltpu.VMEM((T * B, 4 * Hp), f32)],
        cost_estimate=pl.CostEstimate(flops=flops,
                                      transcendentals=transcendentals,
                                      bytes_accessed=bytes_accessed),
    )(x_tm, mask, wih, whh, b, wepi, bepi, b1)


def init_params(key, in_size, hidden, out_size):
    """Deterministic synthetic parameters in PyTorch-native layouts."""
    ks = jax.random.split(key, 10)
    s = 1.0 / float(hidden) ** 0.5
    u = lambda k, shape: jax.random.uniform(k, shape, jnp.float32, -s, s)
    return dict(
        weight_ih=u(ks[0], (4 * hidden, in_size)),   # rnn.weight_ih_l0
        weight_hh=u(ks[1], (4 * hidden, hidden)),    # rnn.weight_hh_l0
        bias_ih=u(ks[2], (4 * hidden,)),
        bias_hh=u(ks[3], (4 * hidden,)),
        w1=u(ks[4], (out_size, hidden)),             # linear_1
        b1=u(ks[5], (out_size,)),
        wa=u(ks[6], (1, hidden)),                    # alpha1 linear
        ba=u(ks[7], (1,)),
        wb=u(ks[8], (1, hidden)),                    # beta1 linear
        bb=u(ks[9], (1,)))


def reference(x, lengths, p):
    """Pure-JAX reference of the same forward semantics (unpadded H)."""
    B, T, _ = x.shape
    H = p["weight_hh"].shape[1]
    wih = p["weight_ih"].T
    whh = p["weight_hh"].T
    b = (p["bias_ih"] + p["bias_hh"])[None, :]

    def cell(carry, x_t):
        h, c = carry
        gates = x_t @ wih + h @ whh + b
        i = jax.nn.sigmoid(gates[:, 0:H])
        f = jax.nn.sigmoid(gates[:, H:2 * H])
        g = jnp.tanh(gates[:, 2 * H:3 * H])
        o = jax.nn.sigmoid(gates[:, 3 * H:4 * H])
        c = f * c + i * g
        h = o * jnp.tanh(c)
        return (h, c), None

    xs = jnp.transpose(x, (1, 0, 2))
    (h_T, _), _ = lax.scan(cell, (jnp.zeros((B, H), jnp.float32),
                                  jnp.zeros((B, H), jnp.float32)), xs)
    h_last = h_T * (lengths >= T).astype(jnp.float32)[:, None]
    alpha = jnp.tanh(h_last @ p["wa"].T + p["ba"])
    z = h_last @ p["wb"].T + p["bb"]
    beta = z - jnp.tanh(z)
    out = h_last * alpha * beta
    return out @ p["w1"].T + p["b1"]


if __name__ == "__main__":
    B, T, IN, H, OUT = 8, 8, 16, 32, 16
    key = jax.random.PRNGKey(0)
    kx, kp = jax.random.split(key, 2)

    x = jax.random.normal(kx, (B, T, IN), jnp.float32)
    # Variable lengths with max(lengths) == T (the padded length).
    lengths = jnp.array([8, 5, 8, 3, 7, 8, 2, 6], jnp.int32)
    params = init_params(kp, IN, H, OUT)

    y = auvita_subnet(x, lengths, params)
    jax.block_until_ready(y)

    y_ref = reference(x, lengths, params)
    assert y.shape == (B, OUT)
    assert jnp.allclose(y, y_ref, atol=1e-2, rtol=1e-2), "mismatch vs reference"
    print("KERNEL_OK")
</pallas_src>

<mosaic_0001>
module attributes {stable_mosaic.version = 11 : i64} {
  func.func @_auvita_kernel(%arg0: memref<64x16xf32, #tpu.memory_space<vmem>>, %arg1: memref<8x1xf32, #tpu.memory_space<vmem>>, %arg2: memref<16x512xf32, #tpu.memory_space<vmem>>, %arg3: memref<128x512xf32, #tpu.memory_space<vmem>>, %arg4: memref<1x512xf32, #tpu.memory_space<vmem>>, %arg5: memref<128x18xf32, #tpu.memory_space<vmem>>, %arg6: memref<1x18xf32, #tpu.memory_space<vmem>>, %arg7: memref<1x16xf32, #tpu.memory_space<vmem>>, %arg8: memref<8x16xf32, #tpu.memory_space<vmem>>, %arg9: memref<64x512xf32, #tpu.memory_space<vmem>>) attributes {dimension_semantics = [], scalar_prefetch = 0 : i64, scratch_operands = 1 : i64, tpu.core_type = #tpu.core_type<tc>} {
    %c0 = arith.constant 0 : index
    %c0_0 = arith.constant 0 : index
    %0 = vector.load %arg0[%c0, %c0_0] : memref<64x16xf32, #tpu.memory_space<vmem>>, vector<64x16xf32>
    %c0_1 = arith.constant 0 : index
    %c0_2 = arith.constant 0 : index
    %1 = vector.load %arg2[%c0_1, %c0_2] : memref<16x512xf32, #tpu.memory_space<vmem>>, vector<16x512xf32>
    %cst = arith.constant dense<0.000000e+00> : vector<64x512xf32>
    %2 = tpu.matmul %0, %1, %cst {dimension_numbers = #tpu.dot_dimension_numbers<[1], [0], [0], [1], [0, 0, 1, 1], [], []>} : vector<64x16xf32>, vector<16x512xf32>, vector<64x512xf32> -> vector<64x512xf32>
    %c0_3 = arith.constant 0 : index
    %c0_4 = arith.constant 0 : index
    %3 = vector.load %arg4[%c0_3, %c0_4] : memref<1x512xf32, #tpu.memory_space<vmem>>, vector<1x512xf32>
    %4 = vector.broadcast %3 : vector<1x512xf32> to vector<64x512xf32>
    %5 = arith.addf %2, %4 : vector<64x512xf32>
    %c0_5 = arith.constant 0 : index
    %c0_6 = arith.constant 0 : index
    %6 = vector.load %arg9[%c0_5, %c0_6] : memref<64x512xf32, #tpu.memory_space<vmem>>, vector<64x512xf32>
    tpu.vector_store %arg9[%c0_5, %c0_6], %5 {strides = array<i32>} : memref<64x512xf32, #tpu.memory_space<vmem>>, vector<64x512xf32>,
    %c0_7 = arith.constant 0 : index
    %c0_8 = arith.constant 0 : index
    %7 = vector.load %arg3[%c0_7, %c0_8] : memref<128x512xf32, #tpu.memory_space<vmem>>, vector<128x512xf32>
    %cst_9 = arith.constant 0.000000e+00 : f32
    %8 = vector.broadcast %cst_9 : f32 to vector<8x128xf32>
    %cst_10 = arith.constant 0.000000e+00 : f32
    %9 = vector.broadcast %cst_10 : f32 to vector<8x128xf32>
    %c0_11 = arith.constant 0 : index
    %c0_12 = arith.constant 0 : index
    %10 = vector.load %arg9[%c0_11, %c0_12] : memref<64x512xf32, #tpu.memory_space<vmem>>, vector<8x512xf32>
    %cst_13 = arith.constant dense<0.000000e+00> : vector<8x512xf32>
    %11 = tpu.matmul %8, %7, %cst_13 {dimension_numbers = #tpu.dot_dimension_numbers<[1], [0], [0], [1], [0, 0, 1, 1], [], []>} : vector<8x128xf32>, vector<128x512xf32>, vector<8x512xf32> -> vector<8x512xf32>
    %12 = arith.addf %10, %11 : vector<8x512xf32>
    %13 = vector.extract_strided_slice %12 {offsets = [0, 0], sizes = [8, 128], strides = [1, 1]} : vector<8x512xf32> to vector<8x128xf32>
    %14 = arith.negf %13 : vector<8x128xf32>
    %15 = math.exp %14 : vector<8x128xf32>
    %cst_14 = arith.constant 1.000000e+00 : f32
    %16 = vector.broadcast %cst_14 : f32 to vector<8x128xf32>
    %17 = arith.addf %16, %15 : vector<8x128xf32>
    %18 = arith.divf %16, %17 : vector<8x128xf32>
    %19 = vector.extract_strided_slice %12 {offsets = [0, 128], sizes = [8, 128], strides = [1, 1]} : vector<8x512xf32> to vector<8x128xf32>
    %20 = arith.negf %19 : vector<8x128xf32>
    %21 = math.exp %20 : vector<8x128xf32>
    %cst_15 = arith.constant 1.000000e+00 : f32
    %22 = vector.broadcast %cst_15 : f32 to vector<8x128xf32>
    %23 = arith.addf %22, %21 : vector<8x128xf32>
    %24 = arith.divf %22, %23 : vector<8x128xf32>
    %25 = vector.extract_strided_slice %12 {offsets = [0, 256], sizes = [8, 128], strides = [1, 1]} : vector<8x512xf32> to vector<8x128xf32>
    %26 = math.tanh %25 : vector<8x128xf32>
    %27 = vector.extract_strided_slice %12 {offsets = [0, 384], sizes = [8, 128], strides = [1, 1]} : vector<8x512xf32> to vector<8x128xf32>
    %28 = arith.negf %27 : vector<8x128xf32>
    %29 = math.exp %28 : vector<8x128xf32>
    %cst_16 = arith.constant 1.000000e+00 : f32
    %30 = vector.broadcast %cst_16 : f32 to vector<8x128xf32>
    %31 = arith.addf %30, %29 : vector<8x128xf32>
    %32 = arith.divf %30, %31 : vector<8x128xf32>
    %33 = arith.mulf %24, %9 : vector<8x128xf32>
    %34 = arith.mulf %18, %26 : vector<8x128xf32>
    %35 = arith.addf %33, %34 : vector<8x128xf32>
    %36 = math.tanh %35 : vector<8x128xf32>
    %37 = arith.mulf %32, %36 : vector<8x128xf32>
    %c8 = arith.constant 8 : index
    %c0_17 = arith.constant 0 : index
    %38 = vector.load %arg9[%c8, %c0_17] : memref<64x512xf32, #tpu.memory_space<vmem>>, vector<8x512xf32>
    %cst_18 = arith.constant dense<0.000000e+00> : vector<8x512xf32>
    %39 = tpu.matmul %37, %7, %cst_18 {dimension_numbers = #tpu.dot_dimension_numbers<[1], [0], [0], [1], [0, 0, 1, 1], [], []>} : vector<8x128xf32>, vector<128x512xf32>, vector<8x512xf32> -> vector<8x512xf32>
    %40 = arith.addf %38, %39 : vector<8x512xf32>
    %41 = vector.extract_strided_slice %40 {offsets = [0, 0], sizes = [8, 128], strides = [1, 1]} : vector<8x512xf32> to vector<8x128xf32>
    %42 = arith.negf %41 : vector<8x128xf32>
    %43 = math.exp %42 : vector<8x128xf32>
    %cst_19 = arith.constant 1.000000e+00 : f32
    %44 = vector.broadcast %cst_19 : f32 to vector<8x128xf32>
    %45 = arith.addf %44, %43 : vector<8x128xf32>
    %46 = arith.divf %44, %45 : vector<8x128xf32>
    %47 = vector.extract_strided_slice %40 {offsets = [0, 128], sizes = [8, 128], strides = [1, 1]} : vector<8x512xf32> to vector<8x128xf32>
    %48 = arith.negf %47 : vector<8x128xf32>
    %49 = math.exp %48 : vector<8x128xf32>
    %cst_20 = arith.constant 1.000000e+00 : f32
    %50 = vector.broadcast %cst_20 : f32 to vector<8x128xf32>
    %51 = arith.addf %50, %49 : vector<8x128xf32>
    %52 = arith.divf %50, %51 : vector<8x128xf32>
    %53 = vector.extract_strided_slice %40 {offsets = [0, 256], sizes = [8, 128], strides = [1, 1]} : vector<8x512xf32> to vector<8x128xf32>
    %54 = math.tanh %53 : vector<8x128xf32>
    %55 = vector.extract_strided_slice %40 {offsets = [0, 384], sizes = [8, 128], strides = [1, 1]} : vector<8x512xf32> to vector<8x128xf32>
    %56 = arith.negf %55 : vector<8x128xf32>
    %57 = math.exp %56 : vector<8x128xf32>
    %cst_21 = arith.constant 1.000000e+00 : f32
    %58 = vector.broadcast %cst_21 : f32 to vector<8x128xf32>
    %59 = arith.addf %58, %57 : vector<8x128xf32>
    %60 = arith.divf %58, %59 : vector<8x128xf32>
    %61 = arith.mulf %52, %35 : vector<8x128xf32>
    %62 = arith.mulf %46, %54 : vector<8x128xf32>
    %63 = arith.addf %61, %62 : vector<8x128xf32>
    %64 = math.tanh %63 : vector<8x128xf32>
    %65 = arith.mulf %60, %64 : vector<8x128xf32>
    %c16 = arith.constant 16 : index
    %c0_22 = arith.constant 0 : index
    %66 = vector.load %arg9[%c16, %c0_22] : memref<64x512xf32, #tpu.memory_space<vmem>>, vector<8x512xf32>
    %cst_23 = arith.constant dense<0.000000e+00> : vector<8x512xf32>
    %67 = tpu.matmul %65, %7, %cst_23 {dimension_numbers = #tpu.dot_dimension_numbers<[1], [0], [0], [1], [0, 0, 1, 1], [], []>} : vector<8x128xf32>, vector<128x512xf32>, vector<8x512xf32> -> vector<8x512xf32>
    %68 = arith.addf %66, %67 : vector<8x512xf32>
    %69 = vector.extract_strided_slice %68 {offsets = [0, 0], sizes = [8, 128], strides = [1, 1]} : vector<8x512xf32> to vector<8x128xf32>
    %70 = arith.negf %69 : vector<8x128xf32>
    %71 = math.exp %70 : vector<8x128xf32>
    %cst_24 = arith.constant 1.000000e+00 : f32
    %72 = vector.broadcast %cst_24 : f32 to vector<8x128xf32>
    %73 = arith.addf %72, %71 : vector<8x128xf32>
    %74 = arith.divf %72, %73 : vector<8x128xf32>
    %75 = vector.extract_strided_slice %68 {offsets = [0, 128], sizes = [8, 128], strides = [1, 1]} : vector<8x512xf32> to vector<8x128xf32>
    %76 = arith.negf %75 : vector<8x128xf32>
    %77 = math.exp %76 : vector<8x128xf32>
    %cst_25 = arith.constant 1.000000e+00 : f32
    %78 = vector.broadcast %cst_25 : f32 to vector<8x128xf32>
    %79 = arith.addf %78, %77 : vector<8x128xf32>
    %80 = arith.divf %78, %79 : vector<8x128xf32>
    %81 = vector.extract_strided_slice %68 {offsets = [0, 256], sizes = [8, 128], strides = [1, 1]} : vector<8x512xf32> to vector<8x128xf32>
    %82 = math.tanh %81 : vector<8x128xf32>
    %83 = vector.extract_strided_slice %68 {offsets = [0, 384], sizes = [8, 128], strides = [1, 1]} : vector<8x512xf32> to vector<8x128xf32>
    %84 = arith.negf %83 : vector<8x128xf32>
    %85 = math.exp %84 : vector<8x128xf32>
    %cst_26 = arith.constant 1.000000e+00 : f32
    %86 = vector.broadcast %cst_26 : f32 to vector<8x128xf32>
    %87 = arith.addf %86, %85 : vector<8x128xf32>
    %88 = arith.divf %86, %87 : vector<8x128xf32>
    %89 = arith.mulf %80, %63 : vector<8x128xf32>
    %90 = arith.mulf %74, %82 : vector<8x128xf32>
    %91 = arith.addf %89, %90 : vector<8x128xf32>
    %92 = math.tanh %91 : vector<8x128xf32>
    %93 = arith.mulf %88, %92 : vector<8x128xf32>
    %c24 = arith.constant 24 : index
    %c0_27 = arith.constant 0 : index
    %94 = vector.load %arg9[%c24, %c0_27] : memref<64x512xf32, #tpu.memory_space<vmem>>, vector<8x512xf32>
    %cst_28 = arith.constant dense<0.000000e+00> : vector<8x512xf32>
    %95 = tpu.matmul %93, %7, %cst_28 {dimension_numbers = #tpu.dot_dimension_numbers<[1], [0], [0], [1], [0, 0, 1, 1], [], []>} : vector<8x128xf32>, vector<128x512xf32>, vector<8x512xf32> -> vector<8x512xf32>
    %96 = arith.addf %94, %95 : vector<8x512xf32>
    %97 = vector.extract_strided_slice %96 {offsets = [0, 0], sizes = [8, 128], strides = [1, 1]} : vector<8x512xf32> to vector<8x128xf32>
    %98 = arith.negf %97 : vector<8x128xf32>
    %99 = math.exp %98 : vector<8x128xf32>
    %cst_29 = arith.constant 1.000000e+00 : f32
    %100 = vector.broadcast %cst_29 : f32 to vector<8x128xf32>
    %101 = arith.addf %100, %99 : vector<8x128xf32>
    %102 = arith.divf %100, %101 : vector<8x128xf32>
    %103 = vector.extract_strided_slice %96 {offsets = [0, 128], sizes = [8, 128], strides = [1, 1]} : vector<8x512xf32> to vector<8x128xf32>
    %104 = arith.negf %103 : vector<8x128xf32>
    %105 = math.exp %104 : vector<8x128xf32>
    %cst_30 = arith.constant 1.000000e+00 : f32
    %106 = vector.broadcast %cst_30 : f32 to vector<8x128xf32>
    %107 = arith.addf %106, %105 : vector<8x128xf32>
    %108 = arith.divf %106, %107 : vector<8x128xf32>
    %109 = vector.extract_strided_slice %96 {offsets = [0, 256], sizes = [8, 128], strides = [1, 1]} : vector<8x512xf32> to vector<8x128xf32>
    %110 = math.tanh %109 : vector<8x128xf32>
    %111 = vector.extract_strided_slice %96 {offsets = [0, 384], sizes = [8, 128], strides = [1, 1]} : vector<8x512xf32> to vector<8x128xf32>
    %112 = arith.negf %111 : vector<8x128xf32>
    %113 = math.exp %112 : vector<8x128xf32>
    %cst_31 = arith.constant 1.000000e+00 : f32
    %114 = vector.broadcast %cst_31 : f32 to vector<8x128xf32>
    %115 = arith.addf %114, %113 : vector<8x128xf32>
    %116 = arith.divf %114, %115 : vector<8x128xf32>
    %117 = arith.mulf %108, %91 : vector<8x128xf32>
    %118 = arith.mulf %102, %110 : vector<8x128xf32>
    %119 = arith.addf %117, %118 : vector<8x128xf32>
    %120 = math.tanh %119 : vector<8x128xf32>
    %121 = arith.mulf %116, %120 : vector<8x128xf32>
    %c32 = arith.constant 32 : index
    %c0_32 = arith.constant 0 : index
    %122 = vector.load %arg9[%c32, %c0_32] : memref<64x512xf32, #tpu.memory_space<vmem>>, vector<8x512xf32>
    %cst_33 = arith.constant dense<0.000000e+00> : vector<8x512xf32>
    %123 = tpu.matmul %121, %7, %cst_33 {dimension_numbers = #tpu.dot_dimension_numbers<[1], [0], [0], [1], [0, 0, 1, 1], [], []>} : vector<8x128xf32>, vector<128x512xf32>, vector<8x512xf32> -> vector<8x512xf32>
    %124 = arith.addf %122, %123 : vector<8x512xf32>
    %125 = vector.extract_strided_slice %124 {offsets = [0, 0], sizes = [8, 128], strides = [1, 1]} : vector<8x512xf32> to vector<8x128xf32>
    %126 = arith.negf %125 : vector<8x128xf32>
    %127 = math.exp %126 : vector<8x128xf32>
    %cst_34 = arith.constant 1.000000e+00 : f32
    %128 = vector.broadcast %cst_34 : f32 to vector<8x128xf32>
    %129 = arith.addf %128, %127 : vector<8x128xf32>
    %130 = arith.divf %128, %129 : vector<8x128xf32>
    %131 = vector.extract_strided_slice %124 {offsets = [0, 128], sizes = [8, 128], strides = [1, 1]} : vector<8x512xf32> to vector<8x128xf32>
    %132 = arith.negf %131 : vector<8x128xf32>
    %133 = math.exp %132 : vector<8x128xf32>
    %cst_35 = arith.constant 1.000000e+00 : f32
    %134 = vector.broadcast %cst_35 : f32 to vector<8x128xf32>
    %135 = arith.addf %134, %133 : vector<8x128xf32>
    %136 = arith.divf %134, %135 : vector<8x128xf32>
    %137 = vector.extract_strided_slice %124 {offsets = [0, 256], sizes = [8, 128], strides = [1, 1]} : vector<8x512xf32> to vector<8x128xf32>
    %138 = math.tanh %137 : vector<8x128xf32>
    %139 = vector.extract_strided_slice %124 {offsets = [0, 384], sizes = [8, 128], strides = [1, 1]} : vector<8x512xf32> to vector<8x128xf32>
    %140 = arith.negf %139 : vector<8x128xf32>
    %141 = math.exp %140 : vector<8x128xf32>
    %cst_36 = arith.constant 1.000000e+00 : f32
    %142 = vector.broadcast %cst_36 : f32 to vector<8x128xf32>
    %143 = arith.addf %142, %141 : vector<8x128xf32>
    %144 = arith.divf %142, %143 : vector<8x128xf32>
    %145 = arith.mulf %136, %119 : vector<8x128xf32>
    %146 = arith.mulf %130, %138 : vector<8x128xf32>
    %147 = arith.addf %145, %146 : vector<8x128xf32>
    %148 = math.tanh %147 : vector<8x128xf32>
    %149 = arith.mulf %144, %148 : vector<8x128xf32>
    %c40 = arith.constant 40 : index
    %c0_37 = arith.constant 0 : index
    %150 = vector.load %arg9[%c40, %c0_37] : memref<64x512xf32, #tpu.memory_space<vmem>>, vector<8x512xf32>
    %cst_38 = arith.constant dense<0.000000e+00> : vector<8x512xf32>
    %151 = tpu.matmul %149, %7, %cst_38 {dimension_numbers = #tpu.dot_dimension_numbers<[1], [0], [0], [1], [0, 0, 1, 1], [], []>} : vector<8x128xf32>, vector<128x512xf32>, vector<8x512xf32> -> vector<8x512xf32>
    %152 = arith.addf %150, %151 : vector<8x512xf32>
    %153 = vector.extract_strided_slice %152 {offsets = [0, 0], sizes = [8, 128], strides = [1, 1]} : vector<8x512xf32> to vector<8x128xf32>
    %154 = arith.negf %153 : vector<8x128xf32>
    %155 = math.exp %154 : vector<8x128xf32>
    %cst_39 = arith.constant 1.000000e+00 : f32
    %156 = vector.broadcast %cst_39 : f32 to vector<8x128xf32>
    %157 = arith.addf %156, %155 : vector<8x128xf32>
    %158 = arith.divf %156, %157 : vector<8x128xf32>
    %159 = vector.extract_strided_slice %152 {offsets = [0, 128], sizes = [8, 128], strides = [1, 1]} : vector<8x512xf32> to vector<8x128xf32>
    %160 = arith.negf %159 : vector<8x128xf32>
    %161 = math.exp %160 : vector<8x128xf32>
    %cst_40 = arith.constant 1.000000e+00 : f32
    %162 = vector.broadcast %cst_40 : f32 to vector<8x128xf32>
    %163 = arith.addf %162, %161 : vector<8x128xf32>
    %164 = arith.divf %162, %163 : vector<8x128xf32>
    %165 = vector.extract_strided_slice %152 {offsets = [0, 256], sizes = [8, 128], strides = [1, 1]} : vector<8x512xf32> to vector<8x128xf32>
    %166 = math.tanh %165 : vector<8x128xf32>
    %167 = vector.extract_strided_slice %152 {offsets = [0, 384], sizes = [8, 128], strides = [1, 1]} : vector<8x512xf32> to vector<8x128xf32>
    %168 = arith.negf %167 : vector<8x128xf32>
    %169 = math.exp %168 : vector<8x128xf32>
    %cst_41 = arith.constant 1.000000e+00 : f32
    %170 = vector.broadcast %cst_41 : f32 to vector<8x128xf32>
    %171 = arith.addf %170, %169 : vector<8x128xf32>
    %172 = arith.divf %170, %171 : vector<8x128xf32>
    %173 = arith.mulf %164, %147 : vector<8x128xf32>
    %174 = arith.mulf %158, %166 : vector<8x128xf32>
    %175 = arith.addf %173, %174 : vector<8x128xf32>
    %176 = math.tanh %175 : vector<8x128xf32>
    %177 = arith.mulf %172, %176 : vector<8x128xf32>
    %c48 = arith.constant 48 : index
    %c0_42 = arith.constant 0 : index
    %178 = vector.load %arg9[%c48, %c0_42] : memref<64x512xf32, #tpu.memory_space<vmem>>, vector<8x512xf32>
    %cst_43 = arith.constant dense<0.000000e+00> : vector<8x512xf32>
    %179 = tpu.matmul %177, %7, %cst_43 {dimension_numbers = #tpu.dot_dimension_numbers<[1], [0], [0], [1], [0, 0, 1, 1], [], []>} : vector<8x128xf32>, vector<128x512xf32>, vector<8x512xf32> -> vector<8x512xf32>
    %180 = arith.addf %178, %179 : vector<8x512xf32>
    %181 = vector.extract_strided_slice %180 {offsets = [0, 0], sizes = [8, 128], strides = [1, 1]} : vector<8x512xf32> to vector<8x128xf32>
    %182 = arith.negf %181 : vector<8x128xf32>
    %183 = math.exp %182 : vector<8x128xf32>
    %cst_44 = arith.constant 1.000000e+00 : f32
    %184 = vector.broadcast %cst_44 : f32 to vector<8x128xf32>
    %185 = arith.addf %184, %183 : vector<8x128xf32>
    %186 = arith.divf %184, %185 : vector<8x128xf32>
    %187 = vector.extract_strided_slice %180 {offsets = [0, 128], sizes = [8, 128], strides = [1, 1]} : vector<8x512xf32> to vector<8x128xf32>
    %188 = arith.negf %187 : vector<8x128xf32>
    %189 = math.exp %188 : vector<8x128xf32>
    %cst_45 = arith.constant 1.000000e+00 : f32
    %190 = vector.broadcast %cst_45 : f32 to vector<8x128xf32>
    %191 = arith.addf %190, %189 : vector<8x128xf32>
    %192 = arith.divf %190, %191 : vector<8x128xf32>
    %193 = vector.extract_strided_slice %180 {offsets = [0, 256], sizes = [8, 128], strides = [1, 1]} : vector<8x512xf32> to vector<8x128xf32>
    %194 = math.tanh %193 : vector<8x128xf32>
    %195 = vector.extract_strided_slice %180 {offsets = [0, 384], sizes = [8, 128], strides = [1, 1]} : vector<8x512xf32> to vector<8x128xf32>
    %196 = arith.negf %195 : vector<8x128xf32>
    %197 = math.exp %196 : vector<8x128xf32>
    %cst_46 = arith.constant 1.000000e+00 : f32
    %198 = vector.broadcast %cst_46 : f32 to vector<8x128xf32>
    %199 = arith.addf %198, %197 : vector<8x128xf32>
    %200 = arith.divf %198, %199 : vector<8x128xf32>
    %201 = arith.mulf %192, %175 : vector<8x128xf32>
    %202 = arith.mulf %186, %194 : vector<8x128xf32>
    %203 = arith.addf %201, %202 : vector<8x128xf32>
    %204 = math.tanh %203 : vector<8x128xf32>
    %205 = arith.mulf %200, %204 : vector<8x128xf32>
    %c56 = arith.constant 56 : index
    %c0_47 = arith.constant 0 : index
    %206 = vector.load %arg9[%c56, %c0_47] : memref<64x512xf32, #tpu.memory_space<vmem>>, vector<8x512xf32>
    %cst_48 = arith.constant dense<0.000000e+00> : vector<8x512xf32>
    %207 = tpu.matmul %205, %7, %cst_48 {dimension_numbers = #tpu.dot_dimension_numbers<[1], [0], [0], [1], [0, 0, 1, 1], [], []>} : vector<8x128xf32>, vector<128x512xf32>, vector<8x512xf32> -> vector<8x512xf32>
    %208 = arith.addf %206, %207 : vector<8x512xf32>
    %209 = vector.extract_strided_slice %208 {offsets = [0, 0], sizes = [8, 128], strides = [1, 1]} : vector<8x512xf32> to vector<8x128xf32>
    %210 = arith.negf %209 : vector<8x128xf32>
    %211 = math.exp %210 : vector<8x128xf32>
    %cst_49 = arith.constant 1.000000e+00 : f32
    %212 = vector.broadcast %cst_49 : f32 to vector<8x128xf32>
    %213 = arith.addf %212, %211 : vector<8x128xf32>
    %214 = arith.divf %212, %213 : vector<8x128xf32>
    %215 = vector.extract_strided_slice %208 {offsets = [0, 128], sizes = [8, 128], strides = [1, 1]} : vector<8x512xf32> to vector<8x128xf32>
    %216 = arith.negf %215 : vector<8x128xf32>
    %217 = math.exp %216 : vector<8x128xf32>
    %cst_50 = arith.constant 1.000000e+00 : f32
    %218 = vector.broadcast %cst_50 : f32 to vector<8x128xf32>
    %219 = arith.addf %218, %217 : vector<8x128xf32>
    %220 = arith.divf %218, %219 : vector<8x128xf32>
    %221 = vector.extract_strided_slice %208 {offsets = [0, 256], sizes = [8, 128], strides = [1, 1]} : vector<8x512xf32> to vector<8x128xf32>
    %222 = math.tanh %221 : vector<8x128xf32>
    %223 = vector.extract_strided_slice %208 {offsets = [0, 384], sizes = [8, 128], strides = [1, 1]} : vector<8x512xf32> to vector<8x128xf32>
    %224 = arith.negf %223 : vector<8x128xf32>
    %225 = math.exp %224 : vector<8x128xf32>
    %cst_51 = arith.constant 1.000000e+00 : f32
    %226 = vector.broadcast %cst_51 : f32 to vector<8x128xf32>
    %227 = arith.addf %226, %225 : vector<8x128xf32>
    %228 = arith.divf %226, %227 : vector<8x128xf32>
    %229 = arith.mulf %220, %203 : vector<8x128xf32>
    %230 = arith.mulf %214, %222 : vector<8x128xf32>
    %231 = arith.addf %229, %230 : vector<8x128xf32>
    %232 = math.tanh %231 : vector<8x128xf32>
    %233 = arith.mulf %228, %232 : vector<8x128xf32>
    %c0_52 = arith.constant 0 : index
    %c0_53 = arith.constant 0 : index
    %234 = vector.load %arg1[%c0_52, %c0_53] : memref<8x1xf32, #tpu.memory_space<vmem>>, vector<8x1xf32>
    %235 = vector.broadcast %234 : vector<8x1xf32> to vector<8x128xf32>
    %236 = arith.mulf %233, %235 : vector<8x128xf32>
    %c0_54 = arith.constant 0 : index
    %c0_55 = arith.constant 0 : index
    %237 = vector.load %arg5[%c0_54, %c0_55] : memref<128x18xf32, #tpu.memory_space<vmem>>, vector<128x18xf32>
    %cst_56 = arith.constant dense<0.000000e+00> : vector<8x18xf32>
    %238 = tpu.matmul %236, %237, %cst_56 {dimension_numbers = #tpu.dot_dimension_numbers<[1], [0], [0], [1], [0, 0, 1, 1], [], []>} : vector<8x128xf32>, vector<128x18xf32>, vector<8x18xf32> -> vector<8x18xf32>
    %c0_57 = arith.constant 0 : index
    %c0_58 = arith.constant 0 : index
    %239 = vector.load %arg6[%c0_57, %c0_58] : memref<1x18xf32, #tpu.memory_space<vmem>>, vector<1x18xf32>
    %240 = vector.broadcast %239 : vector<1x18xf32> to vector<8x18xf32>
    %241 = arith.addf %238, %240 : vector<8x18xf32>
    %242 = vector.extract_strided_slice %241 {offsets = [0, 0], sizes = [8, 16], strides = [1, 1]} : vector<8x18xf32> to vector<8x16xf32>
    %243 = vector.extract_strided_slice %241 {offsets = [0, 16], sizes = [8, 1], strides = [1, 1]} : vector<8x18xf32> to vector<8x1xf32>
    %244 = math.tanh %243 : vector<8x1xf32>
    %245 = vector.extract_strided_slice %241 {offsets = [0, 17], sizes = [8, 1], strides = [1, 1]} : vector<8x18xf32> to vector<8x1xf32>
    %246 = math.tanh %245 : vector<8x1xf32>
    %247 = arith.subf %245, %246 : vector<8x1xf32>
    %248 = arith.mulf %244, %247 : vector<8x1xf32>
    %249 = vector.broadcast %248 : vector<8x1xf32> to vector<8x16xf32>
    %250 = arith.mulf %249, %242 : vector<8x16xf32>
    %c0_59 = arith.constant 0 : index
    %c0_60 = arith.constant 0 : index
    %251 = vector.load %arg7[%c0_59, %c0_60] : memref<1x16xf32, #tpu.memory_space<vmem>>, vector<1x16xf32>
    %252 = vector.broadcast %251 : vector<1x16xf32> to vector<8x16xf32>
    %253 = arith.addf %250, %252 : vector<8x16xf32>
    %c0_61 = arith.constant 0 : index
    %c0_62 = arith.constant 0 : index
    %254 = vector.load %arg8[%c0_61, %c0_62] : memref<8x16xf32, #tpu.memory_space<vmem>>, vector<8x16xf32>
    tpu.vector_store %arg8[%c0_61, %c0_62], %253 {strides = array<i32>} : memref<8x16xf32, #tpu.memory_space<vmem>>, vector<8x16xf32>,
    return
  }
}

</mosaic_0001>

<bundles_post_ra>
// kernel: tpu_custom_call.1
= control target key start
LH: loop header
LB: loop body
LE: loop exit
PB: predicated region body
PF: predicated region fallthrough
CT: control target
= control target key end

     0   :  { %13 = vsyncpa [#allocation4], 0  ;;  %s3450_s0 = inlined_call_operand.vmem [shape: f32[64,16], index: 0, kind: input, shape index: {}]   ;;  %s3451_s1 = inlined_call_operand.vmem [shape: f32[8,1], index: 1, kind: input, shape index: {}]   ;;  %s3452_s2 = inlined_call_operand.vmem [shape: f32[16,512], index: 2, kind: input, shape index: {}]   ;;  %s3453_s3 = inlined_call_operand.hbm [shape: f32[128,512], index: 3, kind: input, shape index: {}]   ;;  %s3454_s4 = inlined_call_operand.vmem [shape: f32[1,512], index: 4, kind: input, shape index: {}]   ;;  %s3455_s5 = inlined_call_operand.vmem [shape: f32[128,18], index: 5, kind: input, shape index: {}]   ;;  %s3456_s6 = inlined_call_operand.vmem [shape: f32[1,18], index: 6, kind: input, shape index: {}]   ;;  %s3457_s7 = inlined_call_operand.vmem [shape: f32[1,16], index: 7, kind: input, shape index: {}]   ;;  %s3458_s8 = inlined_call_operand.hbm [shape: f32[8,16], index: 8, kind: output, shape index: {}]  }
   0x1   :  { %14 = vsyncpa [#allocation5], 0  ;;  %s2302_s27 = smov [#allocation3]  }
   0x2   :  { %s26_s28 = sshll.u32 %s2302_s27, 4  ;;  %s27_s28 = int_to_ptr.vmem [resolvable:$true] %s26_s28 }
   0x3   :  { %s2266_s29 = scalar_lea.vmem %s27_s28, 8192  ;;  %p2271_p1 = scmp.lt.s32.totalorder %s27_s28, %s27_s28 }
   0x4   :  { %p2267_p0 = scmp.ne.s32.totalorder %s27_s28, %s2266_s29  ;;  %p2272_p2 = scmp.lt.s32.totalorder %s2266_s29, %s2266_s29 }
   0x6   :  { %p2273_p3 = por %p2272_p2, %p2271_p1 }
   0x8   :  { %p2274_p4 = pnand %p2273_p3, %p2267_p0 }
   0xa   :  { %2277 = shalt.err (!%p2274_p4)
}
   0xb   :  { %s2303_s30 = smov 512   ;;  %s2304_s9 = smov 32  }
   0xc   :  { %32 = dma.hbm_to_vmem [thread:$0]  %s3453_s3, 8192, %s27_s28, [#allocation4], %s2303_s30, %s2303_s30, %s2304_s9  }
   0xd   :  { %2298 = dma.done.wait [#allocation4], 8192  }
   0xe   :  { %2299 = vsyncadd [#allocation4], 4294959104  ;;  %v3459_v0 = vmov 0.0   ;;  %v57_v1 = vld [vmem:[%s3452_s2 + $0x28] sm:$0xff]  ;;  %v59_v2 = vld [vmem:[%s3452_s2 + $0x38] sm:$0xff]  ;;  %vm82_vm0 = vcmask 130048  }
   0xf   :  { %171 = vmatprep.mubr.f32.mxu0 %v3459_v0  ;;  %284 = vmatprep.mubr.f32.mxu1 %v3459_v0  ;;  %v56_v3 = vld [vmem:[%s3452_s2 + $0x20] sm:$0xff]  ;;  %v58_v4 = vld [vmem:[%s3452_s2 + $0x30] sm:$0xff]  ;;  %v53_v5 = vld [vmem:[%s3452_s2 + $0x8] sm:$0xff]  ;;  %vm2307_vm1 = vmmov 0   ;;  %s2309_s26 = smov 127  }
  0x10   :  { %135 = vmatprep.subr.mxu0 %v57_v1  ;;  %248 = vmatprep.subr.mxu1 %v59_v2  ;;  %v55_v6 = vld [vmem:[%s3452_s2 + $0x18] sm:$0xff]  ;;  %v52_v7 = vld [vmem:[%s3452_s2] sm:$0xff]  ;;  %v54_v8 = vld [vmem:[%s3452_s2 + $0x10] sm:$0xff] }
  0x11   :  { %136 = vmatpush1.msra.mxu0 %v56_v3  ;;  %249 = vmatpush1.msra.mxu1 %v58_v4  ;;  %v44_v9 = vld [vmem:[%s3450_s0] sm:$0xff]  ;;  %v2388_v10 = vld [vmem:[#allocation3 + $0x1e8] sm:$0xff]  ;;  %v2390_v11 = vld [vmem:[#allocation3 + $0x1f8] sm:$0xff] }
  0x12   :  { %137 = vmatprep.subr.mxu0 %v53_v5  ;;  %250 = vmatprep.subr.mxu1 %v55_v6  ;;  %3547 = vst [vmem:[#allocation9_spill] sm:$0xff] %v2388_v10  ;;  %3548 = vst [vmem:[#allocation10_spill] sm:$0xff] %v2390_v11  ;;  %v2392_v12 = vld [vmem:[#allocation3 + $0x1e0] sm:$0xff]  ;;  %v2394_v13 = vld [vmem:[#allocation3 + $0x1f0] sm:$0xff] }
  0x13   :  { %138 = vmatpush1.msra.mxu0 %v52_v7  ;;  %251 = vmatpush1.msra.mxu1 %v54_v8  ;;  %v2398_v14 = vld [vmem:[#allocation3 + $0x1c8] sm:$0xff]  ;;  %v2400_v15 = vld [vmem:[#allocation3 + $0x1d8] sm:$0xff]  ;;  %v2406_v16 = vld [vmem:[#allocation3 + $0x1c0] sm:$0xff] }
  0x14   :  { %1958 = vmatmul.mubr.msk.f32.vlgmr.msra.gmra.mxu0 %vm82_vm0, %v44_v9  ;;  %1966 = vmatmul.mubr.msk.f32.vlgmr.msra.gmra.mxu1 %vm82_vm0, %v44_v9  ;;  %v2408_v17 = vld [vmem:[#allocation3 + $0x1d0] sm:$0xff]  ;;  %v45_v18 = vld [vmem:[%s3450_s0 + $0x8] sm:$0xff]  ;;  %v2419_v20 = vld [vmem:[#allocation3 + $0x1b8] sm:$0xff] }
  0x15   :  { %433 = vmatprep.subr.mxu0 %v2388_v10  ;;  %504 = vmatprep.subr.mxu1 %v2390_v11  ;;  %v2417_v19 = vld [vmem:[#allocation3 + $0x1a8] sm:$0xff]  ;;  %v2423_v21 = vld [vmem:[#allocation3 + $0x1a0] sm:$0xff]  ;;  %v2425_v22 = vld [vmem:[#allocation3 + $0x1b0] sm:$0xff] }
  0x16   :  { %434 = vmatpush1.msra.mxu0 %v2392_v12  ;;  %505 = vmatpush1.msra.mxu1 %v2394_v13  ;;  %v2429_v23 = vld [vmem:[#allocation3 + $0x188] sm:$0xff]  ;;  %v2431_v24 = vld [vmem:[#allocation3 + $0x198] sm:$0xff]  ;;  %v2437_v25 = vld [vmem:[#allocation3 + $0x180] sm:$0xff] }
  0x17   :  { %435 = vmatprep.subr.mxu0 %v2398_v14  ;;  %506 = vmatprep.subr.mxu1 %v2400_v15  ;;  %v2439_v26 = vld [vmem:[#allocation3 + $0x190] sm:$0xff]  ;;  %v2448_v28 = vld [vmem:[#allocation3 + $0x168] sm:$0xff]  ;;  %v2450_v29 = vld [vmem:[#allocation3 + $0x178] sm:$0xff] }
  0x18   :  { %177 = vmatprep.mubr.f32.mxu0 %v3459_v0  ;;  %290 = vmatprep.mubr.f32.mxu1 %v3459_v0  ;;  %v46_v27 = vld [vmem:[%s3450_s0 + $0x10] sm:$0xff]  ;;  %v2454_v30 = vld [vmem:[#allocation3 + $0x160] sm:$0xff]  ;;  %v2460_v32 = vld [vmem:[#allocation3 + $0x148] sm:$0xff] }
  0x19   :  { %436 = vmatpush1.msra.mxu0 %v2406_v16  ;;  %507 = vmatpush1.msra.mxu1 %v2408_v17  ;;  %v2456_v31 = vld [vmem:[#allocation3 + $0x170] sm:$0xff]  ;;  %v2462_v33 = vld [vmem:[#allocation3 + $0x158] sm:$0xff]  ;;  %v2468_v34 = vld [vmem:[#allocation3 + $0x140] sm:$0xff] }
  0x1a   :  { %1959 = vmatmul.mubr.msk.f32.gmra.mxu0 %vm82_vm0, %v45_v18  ;;  %1967 = vmatmul.mubr.msk.f32.gmra.mxu1 %vm82_vm0, %v45_v18  ;;  %v2470_v35 = vld [vmem:[#allocation3 + $0x150] sm:$0xff]  ;;  %v47_v36 = vld [vmem:[%s3450_s0 + $0x18] sm:$0xff]  ;;  %v2479_v37 = vld [vmem:[#allocation3 + $0x128] sm:$0xff] }
  0x1b   :  { %437 = vmatprep.subr.mxu0 %v2417_v19  ;;  %508 = vmatprep.subr.mxu1 %v2419_v20  ;;  %v2481_v38 = vld [vmem:[#allocation3 + $0x138] sm:$0xff]  ;;  %v2485_v39 = vld [vmem:[#allocation3 + $0x120] sm:$0xff]  ;;  %v2487_v40 = vld [vmem:[#allocation3 + $0x130] sm:$0xff] }
  0x1c   :  { %438 = vmatpush1.msra.mxu0 %v2423_v21  ;;  %509 = vmatpush1.msra.mxu1 %v2425_v22  ;;  %v2491_v41 = vld [vmem:[#allocation3 + $0x108] sm:$0xff]  ;;  %v2493_v42 = vld [vmem:[#allocation3 + $0x118] sm:$0xff]  ;;  %v2499_v43 = vld [vmem:[#allocation3 + $0x100] sm:$0xff] }
  0x1d   :  { %439 = vmatprep.subr.mxu0 %v2429_v23  ;;  %510 = vmatprep.subr.mxu1 %v2431_v24  ;;  %v2501_v44 = vld [vmem:[#allocation3 + $0x110] sm:$0xff]  ;;  %v48_v45 = vld [vmem:[%s3450_s0 + $0x20] sm:$0xff]  ;;  %v2510_v46 = vld [vmem:[#allocation3 + $0xe8] sm:$0xff] }
  0x1e   :  { %183 = vmatprep.mubr.f32.mxu0 %v3459_v0  ;;  %296 = vmatprep.mubr.f32.mxu1 %v3459_v0  ;;  %v2512_v47 = vld [vmem:[#allocation3 + $0xf8] sm:$0xff]  ;;  %v2516_v48 = vld [vmem:[#allocation3 + $0xe0] sm:$0xff]  ;;  %v2518_v49 = vld [vmem:[#allocation3 + $0xf0] sm:$0xff] }
  0x1f   :  { %440 = vmatpush1.msra.mxu0 %v2437_v25  ;;  %511 = vmatpush1.msra.mxu1 %v2439_v26  ;;  %v2522_v50 = vld [vmem:[#allocation3 + $0xc8] sm:$0xff]  ;;  %v2524_v51 = vld [vmem:[#allocation3 + $0xd8] sm:$0xff]  ;;  %v2530_v52 = vld [vmem:[#allocation3 + $0xc0] sm:$0xff] }
  0x20   :  { %1960 = vmatmul.mubr.msk.f32.gmra.mxu0 %vm82_vm0, %v46_v27  ;;  %1968 = vmatmul.mubr.msk.f32.gmra.mxu1 %vm82_vm0, %v46_v27  ;;  %v2532_v53 = vld [vmem:[#allocation3 + $0xd0] sm:$0xff]  ;;  %v49_v54 = vld [vmem:[%s3450_s0 + $0x28] sm:$0xff]  ;;  %v2543_v56 = vld [vmem:[#allocation3 + $0xb8] sm:$0xff] }
  0x21   :  { %441 = vmatprep.subr.mxu0 %v2448_v28  ;;  %512 = vmatprep.subr.mxu1 %v2450_v29  ;;  %v2541_v55 = vld [vmem:[#allocation3 + $0xa8] sm:$0xff]  ;;  %v2547_v57 = vld [vmem:[#allocation3 + $0xa0] sm:$0xff]  ;;  %v2549_v58 = vld [vmem:[#allocation3 + $0xb0] sm:$0xff] }
  0x22   :  { %442 = vmatpush1.msra.mxu0 %v2454_v30  ;;  %513 = vmatpush1.msra.mxu1 %v2456_v31  ;;  %v2553_v59 = vld [vmem:[#allocation3 + $0x88] sm:$0xff]  ;;  %v2555_v60 = vld [vmem:[#allocation3 + $0x98] sm:$0xff]  ;;  %v2561_v61 = vld [vmem:[#allocation3 + $0x80] sm:$0xff] }
  0x23   :  { %443 = vmatprep.subr.mxu0 %v2460_v32  ;;  %514 = vmatprep.subr.mxu1 %v2462_v33  ;;  %3549 = vst [vmem:[#allocation11_spill] sm:$0xff] %v2553_v59  ;;  %3550 = vst [vmem:[#allocation12_spill] sm:$0xff] %v2555_v60  ;;  %v2563_v62 = vld [vmem:[#allocation3 + $0x90] sm:$0xff]  ;;  %v2572_v1 = vld [vmem:[#allocation3 + $0x68] sm:$0xff] }
  0x24   :  { %189 = vmatprep.mubr.f32.mxu0 %v3459_v0  ;;  %302 = vmatprep.mubr.f32.mxu1 %v3459_v0  ;;  %3551 = vst [vmem:[#allocation13_spill] sm:$0xff] %v2561_v61  ;;  %3552 = vst [vmem:[#allocation14_spill] sm:$0xff] %v2563_v62  ;;  %v50_v63 = vld [vmem:[%s3450_s0 + $0x30] sm:$0xff]  ;;  %v2574_v2 = vld [vmem:[#allocation3 + $0x78] sm:$0xff] }
  0x25   :  { %444 = vmatpush1.msra.mxu0 %v2468_v34  ;;  %515 = vmatpush1.msra.mxu1 %v2470_v35  ;;  %3553 = vst [vmem:[#allocation15_spill] sm:$0xff] %v2572_v1  ;;  %3554 = vst [vmem:[#allocation16_spill] sm:$0xff] %v2574_v2  ;;  %v2578_v3 = vld [vmem:[#allocation3 + $0x60] sm:$0xff]  ;;  %v2580_v4 = vld [vmem:[#allocation3 + $0x70] sm:$0xff] }
  0x26   :  { %1961 = vmatmul.mubr.msk.f32.gmra.mxu0 %vm82_vm0, %v47_v36  ;;  %1969 = vmatmul.mubr.msk.f32.gmra.mxu1 %vm82_vm0, %v47_v36  ;;  %3555 = vst [vmem:[#allocation17_spill] sm:$0xff] %v2578_v3  ;;  %3556 = vst [vmem:[#allocation18_spill] sm:$0xff] %v2580_v4  ;;  %v2584_v5 = vld [vmem:[#allocation3 + $0x48] sm:$0xff]  ;;  %v2586_v6 = vld [vmem:[#allocation3 + $0x58] sm:$0xff] }
  0x27   :  { %445 = vmatprep.subr.mxu0 %v2479_v37  ;;  %516 = vmatprep.subr.mxu1 %v2481_v38  ;;  %3557 = vst [vmem:[#allocation19_spill] sm:$0xff] %v2584_v5  ;;  %3558 = vst [vmem:[#allocation20_spill] sm:$0xff] %v2586_v6  ;;  %v2592_v7 = vld [vmem:[#allocation3 + $0x40] sm:$0xff]  ;;  %v2594_v8 = vld [vmem:[#allocation3 + $0x50] sm:$0xff] }
  0x28   :  { %446 = vmatpush1.msra.mxu0 %v2485_v39  ;;  %517 = vmatpush1.msra.mxu1 %v2487_v40  ;;  %3559 = vst [vmem:[#allocation21_spill] sm:$0xff] %v2592_v7  ;;  %3560 = vst [vmem:[#allocation22_spill] sm:$0xff] %v2594_v8  ;;  %v51_v9 = vld [vmem:[%s3450_s0 + $0x38] sm:$0xff]  ;;  %v2603_v18 = vld [vmem:[#allocation3 + $0x28] sm:$0xff] }
  0x29   :  { %447 = vmatprep.subr.mxu0 %v2491_v41  ;;  %518 = vmatprep.subr.mxu1 %v2493_v42  ;;  %3561 = vst [vmem:[#allocation23_spill] sm:$0xff] %v2603_v18  ;;  %v2605_v27 = vld [vmem:[#allocation3 + $0x38] sm:$0xff]  ;;  %v2609_v36 = vld [vmem:[#allocation3 + $0x20] sm:$0xff] }
  0x2a   :  { %195 = vmatprep.mubr.f32.mxu0 %v3459_v0  ;;  %308 = vmatprep.mubr.f32.mxu1 %v3459_v0  ;;  %3562 = vst [vmem:[#allocation24_spill] sm:$0xff] %v2605_v27  ;;  %3563 = vst [vmem:[#allocation25_spill] sm:$0xff] %v2609_v36 }
  0x2b   :  { %448 = vmatpush1.msra.mxu0 %v2499_v43  ;;  %519 = vmatpush1.msra.mxu1 %v2501_v44 }
  0x2c   :  { %1962 = vmatmul.mubr.msk.f32.gmra.mxu0 %vm82_vm0, %v48_v45  ;;  %1970 = vmatmul.mubr.msk.f32.gmra.mxu1 %vm82_vm0, %v48_v45  ;;  %v2611_v45 = vld [vmem:[#allocation3 + $0x30] sm:$0xff] }
  0x2d   :  { %449 = vmatprep.subr.mxu0 %v2510_v46  ;;  %520 = vmatprep.subr.mxu1 %v2512_v47  ;;  %3564 = vst [vmem:[#allocation26_spill] sm:$0xff] %v2611_v45 }
  0x2e   :  { %450 = vmatpush1.msra.mxu0 %v2516_v48  ;;  %521 = vmatpush1.msra.mxu1 %v2518_v49 }
  0x2f   :  { %451 = vmatprep.subr.mxu0 %v2522_v50  ;;  %522 = vmatprep.subr.mxu1 %v2524_v51 }
  0x30   :  { %201 = vmatprep.mubr.f32.mxu0 %v3459_v0  ;;  %314 = vmatprep.mubr.f32.mxu1 %v3459_v0 }
  0x31   :  { %452 = vmatpush1.msra.mxu0 %v2530_v52  ;;  %523 = vmatpush1.msra.mxu1 %v2532_v53 }
  0x32   :  { %1963 = vmatmul.mubr.msk.f32.gmra.mxu0 %vm82_vm0, %v49_v54  ;;  %1971 = vmatmul.mubr.msk.f32.gmra.mxu1 %vm82_vm0, %v49_v54  ;;  %v2615_v54 = vld [vmem:[#allocation3 + $0x8] sm:$0xff] }
  0x33   :  { %453 = vmatprep.subr.mxu0 %v2541_v55  ;;  %524 = vmatprep.subr.mxu1 %v2543_v56  ;;  %3565 = vst [vmem:[#allocation27_spill] sm:$0xff] %v2615_v54 }
  0x34   :  { %454 = vmatpush1.msra.mxu0 %v2547_v57  ;;  %525 = vmatpush1.msra.mxu1 %v2549_v58 }
  0x35   :  { %455 = vmatprep.subr.mxu0 %v2553_v59  ;;  %526 = vmatprep.subr.mxu1 %v2555_v60 }
  0x36   :  { %207 = vmatprep.mubr.f32.mxu0 %v3459_v0  ;;  %320 = vmatprep.mubr.f32.mxu1 %v3459_v0 }
  0x37   :  { %456 = vmatpush1.msra.mxu0 %v2561_v61  ;;  %527 = vmatpush1.msra.mxu1 %v2563_v62 }
  0x38   :  { %1964 = vmatmul.mubr.msk.f32.gmra.mxu0 %vm82_vm0, %v50_v63  ;;  %1972 = vmatmul.mubr.msk.f32.gmra.mxu1 %vm82_vm0, %v50_v63  ;;  %v2617_v63 = vld [vmem:[#allocation3 + $0x18] sm:$0xff] }
  0x39   :  { %457 = vmatprep.subr.mxu0 %v2572_v1  ;;  %528 = vmatprep.subr.mxu1 %v2574_v2  ;;  %3566 = vst [vmem:[#allocation28_spill] sm:$0xff] %v2617_v63 }
  0x3a   :  { %458 = vmatpush1.msra.mxu0 %v2578_v3  ;;  %529 = vmatpush1.msra.mxu1 %v2580_v4 }
  0x3b   :  { %459 = vmatprep.subr.mxu0 %v2584_v5  ;;  %530 = vmatprep.subr.mxu1 %v2586_v6 }
  0x3c   :  { %213 = vmatprep.mubr.f32.mxu0 %v3459_v0  ;;  %326 = vmatprep.mubr.f32.mxu1 %v3459_v0  ;;  %v2621_v0 = vld [vmem:[#allocation3] sm:$0xff] }
  0x3d   :  { %460 = vmatpush1.msra.mxu0 %v2592_v7  ;;  %531 = vmatpush1.msra.mxu1 %v2594_v8  ;;  %3567 = vst [vmem:[#allocation29_spill] sm:$0xff] %v2621_v0  ;;  %v2625_v8 = vld [vmem:[#allocation3 + $0x10] sm:$0xff] }
  0x3e   :  { %1965 = vmatmul.mubr.msk.f32.gmra.mxu0 %vm82_vm0, %v51_v9  ;;  %1973 = vmatmul.mubr.msk.f32.gmra.mxu1 %vm82_vm0, %v51_v9  ;;  %3568 = vst [vmem:[#allocation30_spill] sm:$0xff] %v2625_v8  ;;  %v3569_v9 = vmov 0.0  }
  0x3f   :  { %461 = vmatprep.subr.mxu0 %v2603_v18  ;;  %532 = vmatprep.subr.mxu1 %v2605_v27 }
  0x40   :  { %462 = vmatpush1.msra.mxu0 %v2609_v36  ;;  %533 = vmatpush1.msra.mxu1 %v2611_v45 }
  0x41   :  { %463 = vmatprep.subr.mxu0 %v2615_v54  ;;  %534 = vmatprep.subr.mxu1 %v2617_v63 }
  0x42   :  { %464 = vmatpush1.msra.mxu0 %v2621_v0  ;;  %497 = vmatprep.mubr.f32.mxu0 %v3569_v9 }
  0x43   :  { %535 = vmatpush1.msra.mxu1 %v2625_v8  ;;  %568 = vmatprep.mubr.f32.mxu1 %v3569_v9 }
  0x44   :  { %498 = vmatmul.mubr.f32.vlgmr.msra.gmra.mxu0 %v3569_v9  ;;  %569 = vmatmul.mubr.f32.vlgmr.msra.gmra.mxu1 %v3569_v9 }
  0x45   :  { %607 = vmatprep.subr.mxu0 %v2388_v10  ;;  %678 = vmatprep.subr.mxu1 %v2390_v11 }
  0x46   :  { %608 = vmatpush1.msra.mxu0 %v2392_v12  ;;  %679 = vmatpush1.msra.mxu1 %v2394_v13 }
  0x47   :  { %609 = vmatprep.subr.mxu0 %v2398_v14  ;;  %680 = vmatprep.subr.mxu1 %v2400_v15 }
  0x48   :  { %610 = vmatpush1.msra.mxu0 %v2406_v16  ;;  %681 = vmatpush1.msra.mxu1 %v2408_v17 }
  0x49   :  { %611 = vmatprep.subr.mxu0 %v2417_v19  ;;  %682 = vmatprep.subr.mxu1 %v2419_v20 }
  0x4a   :  { %612 = vmatpush1.msra.mxu0 %v2423_v21  ;;  %683 = vmatpush1.msra.mxu1 %v2425_v22 }
  0x4b   :  { %613 = vmatprep.subr.mxu0 %v2429_v23  ;;  %684 = vmatprep.subr.mxu1 %v2431_v24 }
  0x4c   :  { %614 = vmatpush1.msra.mxu0 %v2437_v25  ;;  %685 = vmatpush1.msra.mxu1 %v2439_v26 }
  0x4d   :  { %615 = vmatprep.subr.mxu0 %v2448_v28  ;;  %686 = vmatprep.subr.mxu1 %v2450_v29 }
  0x4e   :  { %616 = vmatpush1.msra.mxu0 %v2454_v30  ;;  %687 = vmatpush1.msra.mxu1 %v2456_v31 }
  0x4f   :  { %617 = vmatprep.subr.mxu0 %v2460_v32  ;;  %688 = vmatprep.subr.mxu1 %v2462_v33 }
  0x50   :  { %618 = vmatpush1.msra.mxu0 %v2468_v34  ;;  %689 = vmatpush1.msra.mxu1 %v2470_v35 }
  0x51   :  { %619 = vmatprep.subr.mxu0 %v2479_v37  ;;  %690 = vmatprep.subr.mxu1 %v2481_v38 }
  0x52   :  { %620 = vmatpush1.msra.mxu0 %v2485_v39  ;;  %691 = vmatpush1.msra.mxu1 %v2487_v40 }
  0x53   :  { %621 = vmatprep.subr.mxu0 %v2491_v41  ;;  %692 = vmatprep.subr.mxu1 %v2493_v42 }
  0x54   :  { %622 = vmatpush1.msra.mxu0 %v2499_v43  ;;  %693 = vmatpush1.msra.mxu1 %v2501_v44 }
  0x55   :  { %623 = vmatprep.subr.mxu0 %v2510_v46  ;;  %694 = vmatprep.subr.mxu1 %v2512_v47 }
  0x56   :  { %624 = vmatpush1.msra.mxu0 %v2516_v48  ;;  %695 = vmatpush1.msra.mxu1 %v2518_v49 }
  0x57   :  { %625 = vmatprep.subr.mxu0 %v2522_v50  ;;  %696 = vmatprep.subr.mxu1 %v2524_v51 }
  0x58   :  { %626 = vmatpush1.msra.mxu0 %v2530_v52  ;;  %697 = vmatpush1.msra.mxu1 %v2532_v53 }
  0x59   :  { %627 = vmatprep.subr.mxu0 %v2541_v55  ;;  %698 = vmatprep.subr.mxu1 %v2543_v56 }
  0x5a   :  { %628 = vmatpush1.msra.mxu0 %v2547_v57  ;;  %699 = vmatpush1.msra.mxu1 %v2549_v58 }
  0x5b   :  { %629 = vmatprep.subr.mxu0 %v2553_v59  ;;  %700 = vmatprep.subr.mxu1 %v2555_v60  ;;  %v3570_v59 = vld [vmem:[#allocation22_spill] sm:$0xff] }
  0x5c   :  { %630 = vmatpush1.msra.mxu0 %v2561_v61  ;;  %701 = vmatpush1.msra.mxu1 %v2563_v62 }
  0x5d   :  { %631 = vmatprep.subr.mxu0 %v2572_v1  ;;  %702 = vmatprep.subr.mxu1 %v2574_v2 }
  0x5e   :  { %632 = vmatpush1.msra.mxu0 %v2578_v3  ;;  %703 = vmatpush1.msra.mxu1 %v2580_v4 }
  0x5f   :  { %633 = vmatprep.subr.mxu0 %v2584_v5  ;;  %704 = vmatprep.subr.mxu1 %v2586_v6 }
  0x60   :  { %634 = vmatpush1.msra.mxu0 %v2592_v7  ;;  %705 = vmatpush1.msra.mxu1 %v3570_v59 }
  0x61   :  { %635 = vmatprep.subr.mxu0 %v2603_v18  ;;  %706 = vmatprep.subr.mxu1 %v2605_v27  ;;  %v62_v27 = vlaneseq }
  0x62   :  { %636 = vmatpush1.msra.mxu0 %v2609_v36  ;;  %707 = vmatpush1.msra.mxu1 %v2611_v45 }
  0x63   :  { %637 = vmatprep.subr.mxu0 %v2615_v54  ;;  %708 = vmatprep.subr.mxu1 %v2617_v63  ;;  %v63_v36 = vshrl.u32 %v62_v27, 7 }
  0x64   :  { %638 = vmatpush1.msra.mxu0 %v2621_v0  ;;  %671 = vmatprep.mubr.f32.mxu0 %v3569_v9  ;;  %v60_v0 = vld [vmem:[%s3454_s4] sm:$0xf] }
  0x65   :  { %709 = vmatpush1.msra.mxu1 %v2625_v8  ;;  %742 = vmatprep.mubr.f32.mxu1 %v3569_v9  ;;  %v64_v54 = vsub.s32 0, %v63_v36  ;;  %v72_v63 = vsub.s32 2, %v63_v36  ;;  %v68_v9 = vsub.s32 1, %v63_v36 }
  0x66   :  { %781 = vmatprep.subr.mxu0 %v2388_v10  ;;  %852 = vmatprep.subr.mxu1 %v2390_v11  ;;  %v76_v10 = vsub.s32 3, %v63_v36 }
  0x67   :  { %v65_v7 = vrot.slane %v60_v0, %v64_v54  ;;  %v2714_v11 = vrot.slane %v60_v0, %v72_v63  ;;  %v69_v5 = vrot.slane %v60_v0, %v68_v9 }
  0x68   :  { %v2716_v4 = vrot.slane %v60_v0, %v76_v10 }
  0xd4   :  { %v2703_v18 = vpop.f32.mrf.mxu0  ;;  %v2705_v45 = vpop.f32.mrf.mxu1 }
  0xd6   :  { %v2710_v59 = vpop.f32.mrf.mxu0  ;;  %v2712_v8 = vpop.f32.mrf.mxu1 }
  0xda   :  { %v179_v27 = vpop.f32.mrf.mxu0  ;;  %v292_v6 = vpop.f32.mrf.mxu1 }
  0xdb   :  { %v2718_v3 = vadd.f32 %v179_v27, %v65_v7  ;;  %v2721_v2 = vadd.f32 %v292_v6, %v2714_v11 }
  0xdc   :  { %v181_v1 = vpop.f32.mrf.mxu0  ;;  %v294_v62 = vpop.f32.mrf.mxu1 }
  0xdd   :  { %3571 = vst [vmem:[#allocation31_spill] sm:$0xff] %v2718_v3  ;;  %3572 = vst [vmem:[#allocation32_spill] sm:$0xff] %v2721_v2  ;;  %v2723_v61 = vadd.f32 %v181_v1, %v69_v5  ;;  %v2726_v60 = vadd.f32 %v294_v62, %v2716_v4 }
  0xdf   :  { %3573 = vst [vmem:[#allocation33_spill] sm:$0xff] %v2723_v61  ;;  %3574 = vst [vmem:[#allocation34_spill] sm:$0xff] %v2726_v60 }
  0xe0   :  { %v185_v36 = vpop.f32.mrf.mxu0  ;;  %v298_v54 = vpop.f32.mrf.mxu1 }
  0xe1   :  { %v2728_v63 = vadd.f32 %v185_v36, %v65_v7  ;;  %v2731_v9 = vadd.f32 %v298_v54, %v2714_v11 }
  0xe2   :  { %v187_v0 = vpop.f32.mrf.mxu0  ;;  %v300_v10 = vpop.f32.mrf.mxu1 }
  0xe3   :  { %3575 = vst [vmem:[#allocation35_spill] sm:$0xff] %v2728_v63  ;;  %3576 = vst [vmem:[#allocation36_spill] sm:$0xff] %v2731_v9  ;;  %v2733_v27 = vadd.f32 %v187_v0, %v69_v5  ;;  %v2736_v6 = vadd.f32 %v300_v10, %v2716_v4 }
  0xe5   :  { %3577 = vst [vmem:[#allocation37_spill] sm:$0xff] %v2733_v27  ;;  %3578 = vst [vmem:[#allocation38_spill] sm:$0xff] %v2736_v6 }
  0xe6   :  { %v191_v2 = vpop.f32.mrf.mxu0  ;;  %v304_v1 = vpop.f32.mrf.mxu1 }
  0xe7   :  { %v2738_v61 = vadd.f32 %v191_v2, %v65_v7  ;;  %v2741_v62 = vadd.f32 %v304_v1, %v2714_v11 }
  0xe8   :  { %v193_v60 = vpop.f32.mrf.mxu0  ;;  %v306_v36 = vpop.f32.mrf.mxu1 }
  0xe9   :  { %3579 = vst [vmem:[#allocation39_spill] sm:$0xff] %v2738_v61  ;;  %3580 = vst [vmem:[#allocation40_spill] sm:$0xff] %v2741_v62  ;;  %v2743_v63 = vadd.f32 %v193_v60, %v69_v5  ;;  %v2746_v54 = vadd.f32 %v306_v36, %v2716_v4 }
  0xeb   :  { %3581 = vst [vmem:[#allocation41_spill] sm:$0xff] %v2743_v63  ;;  %3582 = vst [vmem:[#allocation42_spill] sm:$0xff] %v2746_v54 }
  0xec   :  { %v197_v9 = vpop.f32.mrf.mxu0  ;;  %v310_v0 = vpop.f32.mrf.mxu1 }
  0xed   :  { %v2748_v27 = vadd.f32 %v197_v9, %v65_v7  ;;  %v2751_v10 = vadd.f32 %v310_v0, %v2714_v11 }
  0xee   :  { %v199_v6 = vpop.f32.mrf.mxu0  ;;  %v312_v2 = vpop.f32.mrf.mxu1 }
  0xef   :  { %3583 = vst [vmem:[#allocation43_spill] sm:$0xff] %v2748_v27  ;;  %3584 = vst [vmem:[#allocation44_spill] sm:$0xff] %v2751_v10  ;;  %v2753_v61 = vadd.f32 %v199_v6, %v69_v5  ;;  %v2756_v1 = vadd.f32 %v312_v2, %v2716_v4 }
  0xf1   :  { %3585 = vst [vmem:[#allocation45_spill] sm:$0xff] %v2753_v61  ;;  %3586 = vst [vmem:[#allocation46_spill] sm:$0xff] %v2756_v1 }
  0xf2   :  { %v203_v62 = vpop.f32.mrf.mxu0  ;;  %v316_v60 = vpop.f32.mrf.mxu1 }
  0xf3   :  { %v2758_v63 = vadd.f32 %v203_v62, %v65_v7  ;;  %v2761_v36 = vadd.f32 %v316_v60, %v2714_v11 }
  0xf4   :  { %v205_v54 = vpop.f32.mrf.mxu0  ;;  %v318_v9 = vpop.f32.mrf.mxu1 }
  0xf5   :  { %3587 = vst [vmem:[#allocation47_spill] sm:$0xff] %v2758_v63  ;;  %3588 = vst [vmem:[#allocation48_spill] sm:$0xff] %v2761_v36  ;;  %v2763_v27 = vadd.f32 %v205_v54, %v69_v5  ;;  %v2766_v0 = vadd.f32 %v318_v9, %v2716_v4 }
  0xf7   :  { %3589 = vst [vmem:[#allocation49_spill] sm:$0xff] %v2763_v27  ;;  %3590 = vst [vmem:[#allocation50_spill] sm:$0xff] %v2766_v0 }
  0xf8   :  { %v209_v10 = vpop.f32.mrf.mxu0  ;;  %v322_v6 = vpop.f32.mrf.mxu1 }
  0xf9   :  { %v2768_v61 = vadd.f32 %v209_v10, %v65_v7  ;;  %v2771_v2 = vadd.f32 %v322_v6, %v2714_v11 }
  0xfa   :  { %v211_v1 = vpop.f32.mrf.mxu0  ;;  %v324_v62 = vpop.f32.mrf.mxu1 }
  0xfb   :  { %3591 = vst [vmem:[#allocation51_spill] sm:$0xff] %v2768_v61  ;;  %3592 = vst [vmem:[#allocation52_spill] sm:$0xff] %v2771_v2  ;;  %v2773_v63 = vadd.f32 %v211_v1, %v69_v5  ;;  %v2776_v60 = vadd.f32 %v324_v62, %v2716_v4  ;;  %v174_v1 = vadd.f32 %v2703_v18, %v65_v7 }
  0xfc   :  { %v176_v62 = vadd.f32 %v2710_v59, %v69_v5 }
  0xfd   :  { %3593 = vst [vmem:[#allocation53_spill] sm:$0xff] %v2773_v63  ;;  %3594 = vst [vmem:[#allocation54_spill] sm:$0xff] %v2776_v60 }
  0xfe   :  { %v215_v36 = vpop.f32.mrf.mxu0  ;;  %v328_v54 = vpop.f32.mrf.mxu1 }
  0xff   :  { %v2778_v27 = vadd.f32 %v215_v36, %v65_v7  ;;  %v2781_v9 = vadd.f32 %v328_v54, %v2714_v11 }
 0x100   :  { %v217_v0 = vpop.f32.mrf.mxu0  ;;  %v330_v10 = vpop.f32.mrf.mxu1 }
 0x101   :  { %3595 = vst [vmem:[#allocation55_spill] sm:$0xff] %v2778_v27  ;;  %3596 = vst [vmem:[#allocation56_spill] sm:$0xff] %v2781_v9  ;;  %v2783_v61 = vadd.f32 %v217_v0, %v69_v5  ;;  %v2786_v6 = vadd.f32 %v330_v10, %v2716_v4  ;;  %v289_v0 = vadd.f32 %v2712_v8, %v2716_v4 }
 0x102   :  { %v287_v10 = vadd.f32 %v2705_v45, %v2714_v11 }
 0x103   :  { %3597 = vst [vmem:[#allocation57_spill] sm:$0xff] %v2783_v61  ;;  %3598 = vst [vmem:[#allocation58_spill] sm:$0xff] %v2786_v6 }
 0x104   :  { %v499_v2 = vpop.f32.mrf.mxu0  ;;  %v570_v27 = vpop.f32.mrf.mxu1 }
 0x105   :  { %v575_v60 = vadd.f32 %v499_v2, %v174_v1  ;;  %v577_v6 = vadd.f32 %v570_v27, %v287_v10  ;;  %v3599_v27 = vld [vmem:[#allocation11_spill] sm:$0xff]  ;;  %v3604_v10 = vld [vmem:[#allocation16_spill] sm:$0xff] }
 0x106   :  { %v501_v63 = vpop.f32.mrf.mxu0  ;;  %v572_v9 = vpop.f32.mrf.mxu1 }
 0x107   :  { %v1974_v3 = vmul.f32 -1.442695, %v575_v60  ;;  %v576_v36 = vadd.f32 %v501_v63, %v176_v62  ;;  %v578_v61 = vadd.f32 %v572_v9, %v289_v0  ;;  %v3603_v0 = vld [vmem:[#allocation15_spill] sm:$0xff] }
 0x109   :  { %2064 = vpow2.f32 %v1974_v3  ;;  %v1975_v54 = vmul.f32 -1.442695, %v576_v36  ;;  %v1976_v7 = vmul.f32 -1.442695, %v578_v61  ;;  %v3601_v36 = vld [vmem:[#allocation13_spill] sm:$0xff] }
 0x10b   :  { %2066 = vpow2.f32 %v1975_v54  ;;  %v3602_v54 = vld [vmem:[#allocation14_spill] sm:$0xff] }
 0x10c   :  { %2068 = vpow2.f32 %v1976_v7  ;;  %v3605_v7 = vld [vmem:[#allocation17_spill] sm:$0xff] }
 0x116   :  { %v2065_v18 = vpop.eup %2064 }
 0x117   :  { %v582_v59 = vadd.f32 1.0, %v2065_v18  ;;  %v3606_v18 = vld [vmem:[#allocation18_spill] sm:$0xff] }
 0x118   :  { %v2067_v5 = vpop.eup %2066 }
 0x119   :  { %2070 = vrcp.f32 %v582_v59  ;;  %v588_v63 = vadd.f32 1.0, %v2067_v5  ;;  %v2069_v3 = vpop.eup %2068  ;;  %v3607_v59 = vld [vmem:[#allocation19_spill] sm:$0xff]  ;;  %v3608_v5 = vld [vmem:[#allocation20_spill] sm:$0xff] }
 0x11a   :  { %2072 = vtanh.f32 %v577_v6  ;;  %v595_v62 = vadd.f32 1.0, %v2069_v3  ;;  %v3600_v6 = vld [vmem:[#allocation12_spill] sm:$0xff]  ;;  %v3610_v3 = vld [vmem:[#allocation22_spill] sm:$0xff] }
 0x11b   :  { %2074 = vrcp.f32 %v588_v63  ;;  %v3609_v63 = vld [vmem:[#allocation21_spill] sm:$0xff] }
 0x11c   :  { %2076 = vrcp.f32 %v595_v62  ;;  %v3614_v62 = vld [vmem:[#allocation26_spill] sm:$0xff] }
 0x126   :  { %v2071_v2 = vpop.eup %2070 }
 0x127   :  { %v2073_v60 = vpop.eup %2072 }
 0x128   :  { %v2075_v1 = vpop.eup %2074  ;;  %v599_v8 = vmul.f32 %v2073_v60, %v2071_v2  ;;  %v3611_v2 = vld [vmem:[#allocation23_spill] sm:$0xff]  ;;  %v3612_v60 = vld [vmem:[#allocation24_spill] sm:$0xff] }
 0x129   :  { %v598_v4 = vmul.f32 0.0, %v2075_v1  ;;  %v2077_v11 = vpop.eup %2076  ;;  %v3613_v1 = vld [vmem:[#allocation25_spill] sm:$0xff] }
 0x12b   :  { %v2794_v9 = vadd.f32 %v599_v8, %v598_v4  ;;  %v3615_v4 = vld [vmem:[#allocation27_spill] sm:$0xff]  ;;  %v3616_v8 = vld [vmem:[#allocation28_spill] sm:$0xff] }
 0x12d   :  { %2078 = vtanh.f32 %v2794_v9 }
 0x13a   :  { %v2079_v61 = vpop.eup %2078 }
 0x13b   :  { %v602_v45 = vmul.f32 %v2079_v61, %v2077_v11  ;;  %v3617_v11 = vld [vmem:[#allocation29_spill] sm:$0xff]  ;;  %v3618_v61 = vmov 0.0  }
 0x13d   :  { %672 = vmatmul.mubr.f32.vlgmr.msra.gmra.mxu0 %v602_v45  ;;  %743 = vmatmul.mubr.f32.vlgmr.msra.gmra.mxu1 %v602_v45  ;;  %v3619_v45 = vld [vmem:[#allocation30_spill] sm:$0xff] }
 0x13e   :  { %782 = vmatpush1.msra.mxu0 %v2392_v12  ;;  %853 = vmatpush1.msra.mxu1 %v2394_v13 }
 0x13f   :  { %783 = vmatprep.subr.mxu0 %v2398_v14  ;;  %854 = vmatprep.subr.mxu1 %v2400_v15 }
 0x140   :  { %784 = vmatpush1.msra.mxu0 %v2406_v16  ;;  %855 = vmatpush1.msra.mxu1 %v2408_v17 }
 0x141   :  { %785 = vmatprep.subr.mxu0 %v2417_v19  ;;  %856 = vmatprep.subr.mxu1 %v2419_v20 }
 0x142   :  { %786 = vmatpush1.msra.mxu0 %v2423_v21  ;;  %857 = vmatpush1.msra.mxu1 %v2425_v22 }
 0x143   :  { %787 = vmatprep.subr.mxu0 %v2429_v23  ;;  %858 = vmatprep.subr.mxu1 %v2431_v24 }
 0x144   :  { %788 = vmatpush1.msra.mxu0 %v2437_v25  ;;  %859 = vmatpush1.msra.mxu1 %v2439_v26 }
 0x145   :  { %789 = vmatprep.subr.mxu0 %v2448_v28  ;;  %860 = vmatprep.subr.mxu1 %v2450_v29 }
 0x146   :  { %790 = vmatpush1.msra.mxu0 %v2454_v30  ;;  %861 = vmatpush1.msra.mxu1 %v2456_v31 }
 0x147   :  { %791 = vmatprep.subr.mxu0 %v2460_v32  ;;  %862 = vmatprep.subr.mxu1 %v2462_v33 }
 0x148   :  { %792 = vmatpush1.msra.mxu0 %v2468_v34  ;;  %863 = vmatpush1.msra.mxu1 %v2470_v35 }
 0x149   :  { %793 = vmatprep.subr.mxu0 %v2479_v37  ;;  %864 = vmatprep.subr.mxu1 %v2481_v38 }
 0x14a   :  { %794 = vmatpush1.msra.mxu0 %v2485_v39  ;;  %865 = vmatpush1.msra.mxu1 %v2487_v40 }
 0x14b   :  { %795 = vmatprep.subr.mxu0 %v2491_v41  ;;  %866 = vmatprep.subr.mxu1 %v2493_v42 }
 0x14c   :  { %796 = vmatpush1.msra.mxu0 %v2499_v43  ;;  %867 = vmatpush1.msra.mxu1 %v2501_v44 }
 0x14d   :  { %797 = vmatprep.subr.mxu0 %v2510_v46  ;;  %868 = vmatprep.subr.mxu1 %v2512_v47 }
 0x14e   :  { %798 = vmatpush1.msra.mxu0 %v2516_v48  ;;  %869 = vmatpush1.msra.mxu1 %v2518_v49 }
 0x14f   :  { %799 = vmatprep.subr.mxu0 %v2522_v50  ;;  %870 = vmatprep.subr.mxu1 %v2524_v51 }
 0x150   :  { %800 = vmatpush1.msra.mxu0 %v2530_v52  ;;  %871 = vmatpush1.msra.mxu1 %v2532_v53 }
 0x151   :  { %801 = vmatprep.subr.mxu0 %v2541_v55  ;;  %872 = vmatprep.subr.mxu1 %v2543_v56 }
 0x152   :  { %802 = vmatpush1.msra.mxu0 %v2547_v57  ;;  %873 = vmatpush1.msra.mxu1 %v2549_v58 }
 0x153   :  { %803 = vmatprep.subr.mxu0 %v3599_v27  ;;  %874 = vmatprep.subr.mxu1 %v3600_v6 }
 0x154   :  { %804 = vmatpush1.msra.mxu0 %v3601_v36  ;;  %875 = vmatpush1.msra.mxu1 %v3602_v54 }
 0x155   :  { %805 = vmatprep.subr.mxu0 %v3603_v0  ;;  %876 = vmatprep.subr.mxu1 %v3604_v10  ;;  %v3625_v10 = vld [vmem:[#allocation32_spill] sm:$0xff] }
 0x156   :  { %806 = vmatpush1.msra.mxu0 %v3605_v7  ;;  %877 = vmatpush1.msra.mxu1 %v3606_v18  ;;  %v3624_v7 = vld [vmem:[#allocation34_spill] sm:$0xff] }
 0x157   :  { %807 = vmatprep.subr.mxu0 %v3607_v59  ;;  %878 = vmatprep.subr.mxu1 %v3608_v5 }
 0x158   :  { %808 = vmatpush1.msra.mxu0 %v3609_v63  ;;  %879 = vmatpush1.msra.mxu1 %v3610_v3  ;;  %v3620_v3 = vld [vmem:[#allocation9_spill] sm:$0xff] }
 0x159   :  { %809 = vmatprep.subr.mxu0 %v3611_v2  ;;  %880 = vmatprep.subr.mxu1 %v3612_v60  ;;  %v3621_v2 = vld [vmem:[#allocation10_spill] sm:$0xff] }
 0x15a   :  { %810 = vmatpush1.msra.mxu0 %v3613_v1  ;;  %881 = vmatpush1.msra.mxu1 %v3614_v62  ;;  %v3622_v1 = vld [vmem:[#allocation31_spill] sm:$0xff] }
 0x15b   :  { %811 = vmatprep.subr.mxu0 %v3615_v4  ;;  %882 = vmatprep.subr.mxu1 %v3616_v8  ;;  %v3623_v4 = vld [vmem:[#allocation33_spill] sm:$0xff] }
 0x15c   :  { %812 = vmatpush1.msra.mxu0 %v3617_v11  ;;  %845 = vmatprep.mubr.f32.mxu0 %v3618_v61 }
 0x15d   :  { %883 = vmatpush1.msra.mxu1 %v3619_v45  ;;  %916 = vmatprep.mubr.f32.mxu1 %v3618_v61 }
 0x15e   :  { %955 = vmatprep.subr.mxu0 %v3620_v3  ;;  %1026 = vmatprep.subr.mxu1 %v3621_v2 }
 0x1fd   :  { %v673_v60 = vpop.f32.mrf.mxu0  ;;  %v744_v8 = vpop.f32.mrf.mxu1 }
 0x1fe   :  { %v749_v63 = vadd.f32 %v673_v60, %v3622_v1  ;;  %v751_v61 = vadd.f32 %v744_v8, %v3625_v10 }
 0x1ff   :  { %v675_v62 = vpop.f32.mrf.mxu0  ;;  %v746_v18 = vpop.f32.mrf.mxu1 }
 0x200   :  { %v1977_v5 = vmul.f32 -1.442695, %v749_v63  ;;  %v750_v59 = vadd.f32 %v675_v62, %v3623_v4  ;;  %v752_v45 = vadd.f32 %v746_v18, %v3624_v7 }
 0x202   :  { %2080 = vpow2.f32 %v1977_v5  ;;  %v1978_v11 = vmul.f32 -1.442695, %v750_v59  ;;  %v1979_v0 = vmul.f32 -1.442695, %v752_v45 }
 0x204   :  { %2082 = vpow2.f32 %v1978_v11 }
 0x205   :  { %2084 = vtanh.f32 %v751_v61 }
 0x206   :  { %2086 = vpow2.f32 %v1979_v0 }
 0x20f   :  { %v2081_v3 = vpop.eup %2080 }
 0x210   :  { %v756_v54 = vadd.f32 1.0, %v2081_v3 }
 0x211   :  { %v2083_v2 = vpop.eup %2082 }
 0x212   :  { %2088 = vrcp.f32 %v756_v54  ;;  %v762_v60 = vadd.f32 1.0, %v2083_v2  ;;  %v2085_v63 = vpop.eup %2084  ;;  %v3647_v54 = vld [vmem:[#allocation37_spill] sm:$0xff]  ;;  %v3648_v2 = vld [vmem:[#allocation38_spill] sm:$0xff] }
 0x213   :  { %v2087_v1 = vpop.eup %2086 }
 0x214   :  { %2090 = vrcp.f32 %v762_v60  ;;  %v769_v4 = vadd.f32 1.0, %v2087_v1 }
 0x216   :  { %2092 = vrcp.f32 %v769_v4 }
 0x21f   :  { %v2089_v5 = vpop.eup %2088 }
 0x220   :  { %v773_v62 = vmul.f32 %v2089_v5, %v2085_v63  ;;  %v3649_v63 = vld [vmem:[#allocation36_spill] sm:$0xff] }
 0x221   :  { %v2091_v59 = vpop.eup %2090 }
 0x222   :  { %v772_v11 = vmul.f32 %v2091_v59, %v2794_v9 }
 0x223   :  { %v2093_v10 = vpop.eup %2092 }
 0x224   :  { %v2868_v7 = vadd.f32 %v773_v62, %v772_v11 }
 0x226   :  { %2094 = vtanh.f32 %v2868_v7 }
 0x233   :  { %v2095_v18 = vpop.eup %2094 }
 0x234   :  { %v776_v8 = vmul.f32 %v2095_v18, %v2093_v10 }
 0x236   :  { %846 = vmatmul.mubr.f32.vlgmr.msra.gmra.mxu0 %v776_v8  ;;  %917 = vmatmul.mubr.f32.vlgmr.msra.gmra.mxu1 %v776_v8 }
 0x237   :  { %956 = vmatpush1.msra.mxu0 %v2392_v12  ;;  %1027 = vmatpush1.msra.mxu1 %v2394_v13  ;;  %v3626_v12 = vld [vmem:[#allocation14_spill] sm:$0xff]  ;;  %v3627_v13 = vld [vmem:[#allocation15_spill] sm:$0xff] }
 0x238   :  { %957 = vmatprep.subr.mxu0 %v2398_v14  ;;  %1028 = vmatprep.subr.mxu1 %v2400_v15  ;;  %v3628_v14 = vld [vmem:[#allocation16_spill] sm:$0xff]  ;;  %v3629_v15 = vld [vmem:[#allocation17_spill] sm:$0xff] }
 0x239   :  { %958 = vmatpush1.msra.mxu0 %v2406_v16  ;;  %1029 = vmatpush1.msra.mxu1 %v2408_v17  ;;  %v3630_v16 = vld [vmem:[#allocation18_spill] sm:$0xff]  ;;  %v3631_v17 = vld [vmem:[#allocation19_spill] sm:$0xff] }
 0x23a   :  { %959 = vmatprep.subr.mxu0 %v2417_v19  ;;  %1030 = vmatprep.subr.mxu1 %v2419_v20  ;;  %v3632_v19 = vld [vmem:[#allocation20_spill] sm:$0xff]  ;;  %v3633_v20 = vld [vmem:[#allocation21_spill] sm:$0xff] }
 0x23b   :  { %960 = vmatpush1.msra.mxu0 %v2423_v21  ;;  %1031 = vmatpush1.msra.mxu1 %v2425_v22  ;;  %v3634_v21 = vld [vmem:[#allocation22_spill] sm:$0xff]  ;;  %v3635_v22 = vld [vmem:[#allocation23_spill] sm:$0xff] }
 0x23c   :  { %961 = vmatprep.subr.mxu0 %v2429_v23  ;;  %1032 = vmatprep.subr.mxu1 %v2431_v24  ;;  %v3636_v23 = vld [vmem:[#allocation24_spill] sm:$0xff]  ;;  %v3637_v24 = vld [vmem:[#allocation25_spill] sm:$0xff] }
 0x23d   :  { %962 = vmatpush1.msra.mxu0 %v2437_v25  ;;  %1033 = vmatpush1.msra.mxu1 %v2439_v26  ;;  %v3638_v25 = vld [vmem:[#allocation26_spill] sm:$0xff]  ;;  %v3639_v26 = vld [vmem:[#allocation27_spill] sm:$0xff] }
 0x23e   :  { %963 = vmatprep.subr.mxu0 %v2448_v28  ;;  %1034 = vmatprep.subr.mxu1 %v2450_v29  ;;  %v3640_v28 = vld [vmem:[#allocation28_spill] sm:$0xff]  ;;  %v3641_v29 = vld [vmem:[#allocation29_spill] sm:$0xff] }
 0x23f   :  { %964 = vmatpush1.msra.mxu0 %v2454_v30  ;;  %1035 = vmatpush1.msra.mxu1 %v2456_v31  ;;  %v3642_v30 = vmov 0.0   ;;  %v3643_v31 = vld [vmem:[#allocation30_spill] sm:$0xff] }
 0x240   :  { %965 = vmatprep.subr.mxu0 %v2460_v32  ;;  %1036 = vmatprep.subr.mxu1 %v2462_v33  ;;  %v2935_v32 = vld [vmem:[#allocation3 + $0x1e8] sm:$0xff]  ;;  %v2938_v33 = vld [vmem:[#allocation3 + $0x1f8] sm:$0xff] }
 0x241   :  { %966 = vmatpush1.msra.mxu0 %v2468_v34  ;;  %1037 = vmatpush1.msra.mxu1 %v2470_v35  ;;  %3644 = vst [vmem:[#allocation11_spill] sm:$0xff] %v2935_v32  ;;  %3645 = vst [vmem:[#allocation12_spill] sm:$0xff] %v2938_v33  ;;  %v3646_v35 = vld [vmem:[#allocation35_spill] sm:$0xff] }
 0x242   :  { %967 = vmatprep.subr.mxu0 %v2479_v37  ;;  %1038 = vmatprep.subr.mxu1 %v2481_v38 }
 0x243   :  { %968 = vmatpush1.msra.mxu0 %v2485_v39  ;;  %1039 = vmatpush1.msra.mxu1 %v2487_v40 }
 0x244   :  { %969 = vmatprep.subr.mxu0 %v2491_v41  ;;  %1040 = vmatprep.subr.mxu1 %v2493_v42 }
 0x245   :  { %970 = vmatpush1.msra.mxu0 %v2499_v43  ;;  %1041 = vmatpush1.msra.mxu1 %v2501_v44 }
 0x246   :  { %971 = vmatprep.subr.mxu0 %v2510_v46  ;;  %1042 = vmatprep.subr.mxu1 %v2512_v47 }
 0x247   :  { %972 = vmatpush1.msra.mxu0 %v2516_v48  ;;  %1043 = vmatpush1.msra.mxu1 %v2518_v49 }
 0x248   :  { %973 = vmatprep.subr.mxu0 %v2522_v50  ;;  %1044 = vmatprep.subr.mxu1 %v2524_v51 }
 0x249   :  { %974 = vmatpush1.msra.mxu0 %v2530_v52  ;;  %1045 = vmatpush1.msra.mxu1 %v2532_v53 }
 0x24a   :  { %975 = vmatprep.subr.mxu0 %v2541_v55  ;;  %1046 = vmatprep.subr.mxu1 %v2543_v56 }
 0x24b   :  { %976 = vmatpush1.msra.mxu0 %v2547_v57  ;;  %1047 = vmatpush1.msra.mxu1 %v2549_v58 }
 0x24c   :  { %977 = vmatprep.subr.mxu0 %v3599_v27  ;;  %1048 = vmatprep.subr.mxu1 %v3600_v6 }
 0x24d   :  { %978 = vmatpush1.msra.mxu0 %v3601_v36  ;;  %1049 = vmatpush1.msra.mxu1 %v3626_v12 }
 0x24e   :  { %979 = vmatprep.subr.mxu0 %v3627_v13  ;;  %1050 = vmatprep.subr.mxu1 %v3628_v14 }
 0x24f   :  { %980 = vmatpush1.msra.mxu0 %v3629_v15  ;;  %1051 = vmatpush1.msra.mxu1 %v3630_v16 }
 0x250   :  { %981 = vmatprep.subr.mxu0 %v3631_v17  ;;  %1052 = vmatprep.subr.mxu1 %v3632_v19 }
 0x251   :  { %982 = vmatpush1.msra.mxu0 %v3633_v20  ;;  %1053 = vmatpush1.msra.mxu1 %v3634_v21 }
 0x252   :  { %983 = vmatprep.subr.mxu0 %v3635_v22  ;;  %1054 = vmatprep.subr.mxu1 %v3636_v23 }
 0x253   :  { %984 = vmatpush1.msra.mxu0 %v3637_v24  ;;  %1055 = vmatpush1.msra.mxu1 %v3638_v25 }
 0x254   :  { %985 = vmatprep.subr.mxu0 %v3639_v26  ;;  %1056 = vmatprep.subr.mxu1 %v3640_v28 }
 0x255   :  { %986 = vmatpush1.msra.mxu0 %v3641_v29  ;;  %1019 = vmatprep.mubr.f32.mxu0 %v3642_v30 }
 0x256   :  { %1057 = vmatpush1.msra.mxu1 %v3643_v31  ;;  %1090 = vmatprep.mubr.f32.mxu1 %v3642_v30 }
 0x257   :  { %1129 = vmatprep.subr.mxu0 %v2935_v32  ;;  %1200 = vmatprep.subr.mxu1 %v2938_v33 }
 0x2f6   :  { %v847_v34 = vpop.f32.mrf.mxu0  ;;  %v918_v61 = vpop.f32.mrf.mxu1 }
 0x2f7   :  { %v923_v37 = vadd.f32 %v847_v34, %v3646_v35  ;;  %v925_v1 = vadd.f32 %v918_v61, %v3649_v63  ;;  %v2964_v63 = vld [vmem:[#allocation3 + $0x1d0] sm:$0xff] }
 0x2f8   :  { %v849_v38 = vpop.f32.mrf.mxu0  ;;  %v920_v3 = vpop.f32.mrf.mxu1 }
 0x2f9   :  { %v1980_v9 = vmul.f32 -1.442695, %v923_v37  ;;  %v924_v0 = vadd.f32 %v849_v38, %v3647_v54  ;;  %v926_v60 = vadd.f32 %v920_v3, %v3648_v2  ;;  %v2952_v3 = vld [vmem:[#allocation3 + $0x1f0] sm:$0xff]  ;;  %v2955_v2 = vld [vmem:[#allocation3 + $0x1c8] sm:$0xff] }
 0x2fb   :  { %2096 = vpow2.f32 %v1980_v9  ;;  %v1981_v45 = vmul.f32 -1.442695, %v924_v0  ;;  %v1982_v5 = vmul.f32 -1.442695, %v926_v60  ;;  %v2961_v60 = vld [vmem:[#allocation3 + $0x1c0] sm:$0xff] }
 0x2fd   :  { %2098 = vpow2.f32 %v1981_v45  ;;  %v2949_v45 = vld [vmem:[#allocation3 + $0x1e0] sm:$0xff] }
 0x2fe   :  { %2100 = vtanh.f32 %v925_v1  ;;  %v2967_v1 = vld [vmem:[#allocation3 + $0x1a8] sm:$0xff] }
 0x2ff   :  { %2102 = vpow2.f32 %v1982_v5  ;;  %v2970_v5 = vld [vmem:[#allocation3 + $0x1b8] sm:$0xff] }
 0x308   :  { %v2097_v62 = vpop.eup %2096 }
 0x309   :  { %v930_v59 = vadd.f32 1.0, %v2097_v62  ;;  %v2973_v62 = vld [vmem:[#allocation3 + $0x1a0] sm:$0xff] }
 0x30a   :  { %v2099_v4 = vpop.eup %2098 }
 0x30b   :  { %2104 = vrcp.f32 %v930_v59  ;;  %v936_v11 = vadd.f32 1.0, %v2099_v4  ;;  %v2101_v10 = vpop.eup %2100  ;;  %v2976_v59 = vld [vmem:[#allocation3 + $0x1b0] sm:$0xff]  ;;  %v2979_v4 = vld [vmem:[#allocation3 + $0x188] sm:$0xff] }
 0x30c   :  { %v2103_v18 = vpop.eup %2102 }
 0x30d   :  { %2106 = vrcp.f32 %v936_v11  ;;  %v943_v37 = vadd.f32 1.0, %v2103_v18  ;;  %v2982_v11 = vld [vmem:[#allocation3 + $0x198] sm:$0xff]  ;;  %v2988_v18 = vld [vmem:[#allocation3 + $0x190] sm:$0xff] }
 0x30f   :  { %2108 = vrcp.f32 %v943_v37  ;;  %v3000_v37 = vld [vmem:[#allocation3 + $0x170] sm:$0xff] }
 0x310   :  { %3651 = vst [vmem:[#allocation9_spill] sm:$0xff] %v3000_v37 }
 0x318   :  { %v2105_v8 = vpop.eup %2104 }
 0x319   :  { %v947_v34 = vmul.f32 %v2105_v8, %v2101_v10  ;;  %v2985_v10 = vld [vmem:[#allocation3 + $0x180] sm:$0xff]  ;;  %v2991_v8 = vld [vmem:[#allocation3 + $0x168] sm:$0xff] }
 0x31a   :  { %v2107_v35 = vpop.eup %2106 }
 0x31b   :  { %v946_v38 = vmul.f32 %v2107_v35, %v2868_v7  ;;  %v2958_v7 = vld [vmem:[#allocation3 + $0x1d8] sm:$0xff]  ;;  %v2997_v35 = vld [vmem:[#allocation3 + $0x160] sm:$0xff] }
 0x31c   :  { %v2109_v54 = vpop.eup %2108  ;;  %3650 = vst [vmem:[#allocation13_spill] sm:$0xff] %v2997_v35 }
 0x31d   :  { %v2946_v9 = vadd.f32 %v947_v34, %v946_v38  ;;  %v2994_v34 = vld [vmem:[#allocation3 + $0x178] sm:$0xff]  ;;  %v3003_v38 = vld [vmem:[#allocation3 + $0x148] sm:$0xff] }
 0x31f   :  { %2110 = vtanh.f32 %v2946_v9 }
 0x32c   :  { %v2111_v0 = vpop.eup %2110 }
 0x32d   :  { %v950_v61 = vmul.f32 %v2111_v0, %v2109_v54  ;;  %v3006_v54 = vld [vmem:[#allocation3 + $0x158] sm:$0xff]  ;;  %v3009_v0 = vld [vmem:[#allocation3 + $0x140] sm:$0xff] }
 0x32f   :  { %1020 = vmatmul.mubr.f32.vlgmr.msra.gmra.mxu0 %v950_v61  ;;  %1091 = vmatmul.mubr.f32.vlgmr.msra.gmra.mxu1 %v950_v61  ;;  %v3012_v61 = vld [vmem:[#allocation3 + $0x150] sm:$0xff] }
 0x330   :  { %1130 = vmatpush1.msra.mxu0 %v2949_v45  ;;  %1201 = vmatpush1.msra.mxu1 %v2952_v3 }
 0x331   :  { %1131 = vmatprep.subr.mxu0 %v2955_v2  ;;  %1202 = vmatprep.subr.mxu1 %v2958_v7 }
 0x332   :  { %1132 = vmatpush1.msra.mxu0 %v2961_v60  ;;  %1203 = vmatpush1.msra.mxu1 %v2964_v63 }
 0x333   :  { %1133 = vmatprep.subr.mxu0 %v2967_v1  ;;  %1204 = vmatprep.subr.mxu1 %v2970_v5 }
 0x334   :  { %1134 = vmatpush1.msra.mxu0 %v2973_v62  ;;  %1205 = vmatpush1.msra.mxu1 %v2976_v59 }
 0x335   :  { %1135 = vmatprep.subr.mxu0 %v2979_v4  ;;  %1206 = vmatprep.subr.mxu1 %v2982_v11 }
 0x336   :  { %1136 = vmatpush1.msra.mxu0 %v2985_v10  ;;  %1207 = vmatpush1.msra.mxu1 %v2988_v18 }
 0x337   :  { %1137 = vmatprep.subr.mxu0 %v2991_v8  ;;  %1208 = vmatprep.subr.mxu1 %v2994_v34 }
 0x338   :  { %1138 = vmatpush1.msra.mxu0 %v2997_v35  ;;  %1209 = vmatpush1.msra.mxu1 %v3000_v37  ;;  %v3015_v35 = vld [vmem:[#allocation3 + $0x128] sm:$0xff]  ;;  %v3018_v37 = vld [vmem:[#allocation3 + $0x138] sm:$0xff] }
 0x339   :  { %1139 = vmatprep.subr.mxu0 %v3003_v38  ;;  %1210 = vmatprep.subr.mxu1 %v3006_v54 }
 0x33a   :  { %1140 = vmatpush1.msra.mxu0 %v3009_v0  ;;  %1211 = vmatpush1.msra.mxu1 %v3012_v61 }
 0x33b   :  { %1141 = vmatprep.subr.mxu0 %v3015_v35  ;;  %1212 = vmatprep.subr.mxu1 %v3018_v37 }
 0x33c   :  { %1142 = vmatpush1.msra.mxu0 %v2485_v39  ;;  %1213 = vmatpush1.msra.mxu1 %v2487_v40  ;;  %v3652_v40 = vld [vmem:[#allocation39_spill] sm:$0xff] }
 0x33d   :  { %1143 = vmatprep.subr.mxu0 %v2491_v41  ;;  %1214 = vmatprep.subr.mxu1 %v2493_v42 }
 0x33e   :  { %1144 = vmatpush1.msra.mxu0 %v2499_v43  ;;  %1215 = vmatpush1.msra.mxu1 %v2501_v44  ;;  %v3653_v44 = vld [vmem:[#allocation41_spill] sm:$0xff] }
 0x33f   :  { %1145 = vmatprep.subr.mxu0 %v2510_v46  ;;  %1216 = vmatprep.subr.mxu1 %v2512_v47 }
 0x340   :  { %1146 = vmatpush1.msra.mxu0 %v2516_v48  ;;  %1217 = vmatpush1.msra.mxu1 %v2518_v49 }
 0x341   :  { %1147 = vmatprep.subr.mxu0 %v2522_v50  ;;  %1218 = vmatprep.subr.mxu1 %v2524_v51  ;;  %v3654_v50 = vld [vmem:[#allocation42_spill] sm:$0xff] }
 0x342   :  { %1148 = vmatpush1.msra.mxu0 %v2530_v52  ;;  %1219 = vmatpush1.msra.mxu1 %v2532_v53  ;;  %v3655_v52 = vld [vmem:[#allocation40_spill] sm:$0xff] }
 0x343   :  { %1149 = vmatprep.subr.mxu0 %v2541_v55  ;;  %1220 = vmatprep.subr.mxu1 %v2543_v56 }
 0x344   :  { %1150 = vmatpush1.msra.mxu0 %v2547_v57  ;;  %1221 = vmatpush1.msra.mxu1 %v2549_v58 }
 0x345   :  { %1151 = vmatprep.subr.mxu0 %v3599_v27  ;;  %1222 = vmatprep.subr.mxu1 %v3600_v6 }
 0x346   :  { %1152 = vmatpush1.msra.mxu0 %v3601_v36  ;;  %1223 = vmatpush1.msra.mxu1 %v3626_v12 }
 0x347   :  { %1153 = vmatprep.subr.mxu0 %v3627_v13  ;;  %1224 = vmatprep.subr.mxu1 %v3628_v14 }
 0x348   :  { %1154 = vmatpush1.msra.mxu0 %v3629_v15  ;;  %1225 = vmatpush1.msra.mxu1 %v3630_v16 }
 0x349   :  { %1155 = vmatprep.subr.mxu0 %v3631_v17  ;;  %1226 = vmatprep.subr.mxu1 %v3632_v19 }
 0x34a   :  { %1156 = vmatpush1.msra.mxu0 %v3633_v20  ;;  %1227 = vmatpush1.msra.mxu1 %v3634_v21 }
 0x34b   :  { %1157 = vmatprep.subr.mxu0 %v3635_v22  ;;  %1228 = vmatprep.subr.mxu1 %v3636_v23  ;;  %v3656_v22 = vld [vmem:[#allocation13_spill] sm:$0xff] }
 0x34c   :  { %1158 = vmatpush1.msra.mxu0 %v3637_v24  ;;  %1229 = vmatpush1.msra.mxu1 %v3638_v25  ;;  %v3657_v23 = vld [vmem:[#allocation9_spill] sm:$0xff]  ;;  %v3095_v24 = vld [vmem:[#allocation3 + $0x120] sm:$0xff]  ;;  %v3098_v25 = vld [vmem:[#allocation3 + $0x130] sm:$0xff] }
 0x34d   :  { %1159 = vmatprep.subr.mxu0 %v3639_v26  ;;  %1230 = vmatprep.subr.mxu1 %v3640_v28  ;;  %v3101_v26 = vld [vmem:[#allocation3 + $0x108] sm:$0xff]  ;;  %v3104_v28 = vld [vmem:[#allocation3 + $0x118] sm:$0xff] }
 0x34e   :  { %1160 = vmatpush1.msra.mxu0 %v3641_v29  ;;  %1193 = vmatprep.mubr.f32.mxu0 %v3642_v30  ;;  %v3107_v29 = vld [vmem:[#allocation3 + $0x100] sm:$0xff] }
 0x34f   :  { %1231 = vmatpush1.msra.mxu1 %v3643_v31  ;;  %1264 = vmatprep.mubr.f32.mxu1 %v3642_v30  ;;  %v3110_v31 = vld [vmem:[#allocation3 + $0x110] sm:$0xff] }
 0x350   :  { %1303 = vmatprep.subr.mxu0 %v2935_v32  ;;  %1374 = vmatprep.subr.mxu1 %v2938_v33 }
 0x3ef   :  { %v1021_v39 = vpop.f32.mrf.mxu0  ;;  %v1092_v47 = vpop.f32.mrf.mxu1 }
 0x3f0   :  { %v1097_v41 = vadd.f32 %v1021_v39, %v3652_v40  ;;  %v1099_v53 = vadd.f32 %v1092_v47, %v3655_v52  ;;  %v3116_v39 = vld [vmem:[#allocation3 + $0xf8] sm:$0xff]  ;;  %v3119_v40 = vld [vmem:[#allocation3 + $0xe0] sm:$0xff]  ;;  %v3137_v47 = vld [vmem:[#allocation3 + $0xa8] sm:$0xff] }
 0x3f1   :  { %v1023_v42 = vpop.f32.mrf.mxu0  ;;  %v1094_v49 = vpop.f32.mrf.mxu1  ;;  %v3152_v52 = vld [vmem:[#allocation3 + $0x98] sm:$0xff] }
 0x3f2   :  { %v1983_v43 = vmul.f32 -1.442695, %v1097_v41  ;;  %v1098_v46 = vadd.f32 %v1023_v42, %v3653_v44  ;;  %v1100_v51 = vadd.f32 %v1094_v49, %v3654_v50  ;;  %v3122_v41 = vld [vmem:[#allocation3 + $0xf0] sm:$0xff]  ;;  %v3125_v42 = vld [vmem:[#allocation3 + $0xc8] sm:$0xff]  ;;  %v3131_v44 = vld [vmem:[#allocation3 + $0xc0] sm:$0xff] }
 0x3f3   :  { %v3143_v49 = vld [vmem:[#allocation3 + $0xa0] sm:$0xff]  ;;  %v3146_v50 = vld [vmem:[#allocation3 + $0xb0] sm:$0xff] }
 0x3f4   :  { %2112 = vpow2.f32 %v1983_v43  ;;  %v1984_v48 = vmul.f32 -1.442695, %v1098_v46  ;;  %v1985_v55 = vmul.f32 -1.442695, %v1100_v51  ;;  %v3128_v43 = vld [vmem:[#allocation3 + $0xd8] sm:$0xff]  ;;  %v3134_v46 = vld [vmem:[#allocation3 + $0xd0] sm:$0xff] }
 0x3f5   :  { %v3149_v51 = vld [vmem:[#allocation3 + $0x88] sm:$0xff] }
 0x3f6   :  { %2114 = vpow2.f32 %v1984_v48  ;;  %v3140_v48 = vld [vmem:[#allocation3 + $0xb8] sm:$0xff] }
 0x3f7   :  { %2116 = vtanh.f32 %v1099_v53  ;;  %v3155_v53 = vld [vmem:[#allocation3 + $0x80] sm:$0xff] }
 0x3f8   :  { %2118 = vpow2.f32 %v1985_v55  ;;  %v3158_v55 = vld [vmem:[#allocation3 + $0x90] sm:$0xff] }
 0x3f9   :  { %3658 = vst [vmem:[#allocation10_spill] sm:$0xff] %v3158_v55 }
 0x401   :  { %v2113_v56 = vpop.eup %2112 }
 0x402   :  { %v1104_v57 = vadd.f32 1.0, %v2113_v56  ;;  %v3161_v56 = vld [vmem:[#allocation3 + $0x68] sm:$0xff] }
 0x403   :  { %v2115_v58 = vpop.eup %2114  ;;  %3659 = vst [vmem:[#allocation31_spill] sm:$0xff] %v3161_v56 }
 0x404   :  { %2120 = vrcp.f32 %v1104_v57  ;;  %v1110_v27 = vadd.f32 1.0, %v2115_v58  ;;  %v2117_v6 = vpop.eup %2116  ;;  %v3164_v57 = vld [vmem:[#allocation3 + $0x78] sm:$0xff]  ;;  %v3167_v58 = vld [vmem:[#allocation3 + $0x60] sm:$0xff] }
 0x405   :  { %v2119_v36 = vpop.eup %2118  ;;  %3660 = vst [vmem:[#allocation33_spill] sm:$0xff] %v3164_v57  ;;  %3661 = vst [vmem:[#allocation34_spill] sm:$0xff] %v3167_v58 }
 0x406   :  { %2122 = vrcp.f32 %v1110_v27  ;;  %v1117_v15 = vadd.f32 1.0, %v2119_v36  ;;  %v3170_v27 = vld [vmem:[#allocation3 + $0x70] sm:$0xff]  ;;  %v3176_v36 = vld [vmem:[#allocation3 + $0x58] sm:$0xff] }
 0x407   :  { %3662 = vst [vmem:[#allocation32_spill] sm:$0xff] %v3170_v27  ;;  %3664 = vst [vmem:[#allocation15_spill] sm:$0xff] %v3176_v36 }
 0x408   :  { %2124 = vrcp.f32 %v1117_v15  ;;  %v3188_v15 = vld [vmem:[#allocation3 + $0x38] sm:$0xff] }
 0x409   :  { %3668 = vst [vmem:[#allocation19_spill] sm:$0xff] %v3188_v15 }
 0x411   :  { %v2121_v12 = vpop.eup %2120 }
 0x412   :  { %v1121_v13 = vmul.f32 %v2121_v12, %v2117_v6  ;;  %v3173_v6 = vld [vmem:[#allocation3 + $0x48] sm:$0xff]  ;;  %v3179_v12 = vld [vmem:[#allocation3 + $0x40] sm:$0xff] }
 0x413   :  { %v2123_v14 = vpop.eup %2122  ;;  %3663 = vst [vmem:[#allocation14_spill] sm:$0xff] %v3173_v6  ;;  %3665 = vst [vmem:[#allocation16_spill] sm:$0xff] %v3179_v12 }
 0x414   :  { %v1120_v16 = vmul.f32 %v2123_v14, %v2946_v9  ;;  %v3113_v9 = vld [vmem:[#allocation3 + $0xe8] sm:$0xff] }
 0x415   :  { %v2125_v19 = vpop.eup %2124  ;;  %v3185_v14 = vld [vmem:[#allocation3 + $0x28] sm:$0xff] }
 0x416   :  { %v3068_v17 = vadd.f32 %v1121_v13, %v1120_v16  ;;  %v3182_v13 = vld [vmem:[#allocation3 + $0x50] sm:$0xff]  ;;  %3667 = vst [vmem:[#allocation18_spill] sm:$0xff] %v3185_v14  ;;  %v3191_v16 = vld [vmem:[#allocation3 + $0x20] sm:$0xff] }
 0x417   :  { %3666 = vst [vmem:[#allocation17_spill] sm:$0xff] %v3182_v13  ;;  %3669 = vst [vmem:[#allocation20_spill] sm:$0xff] %v3191_v16 }
 0x418   :  { %2126 = vtanh.f32 %v3068_v17 }
 0x425   :  { %v2127_v20 = vpop.eup %2126 }
 0x426   :  { %v1124_v21 = vmul.f32 %v2127_v20, %v2125_v19  ;;  %v3194_v19 = vld [vmem:[#allocation3 + $0x30] sm:$0xff]  ;;  %v3197_v20 = vld [vmem:[#allocation3 + $0x8] sm:$0xff] }
 0x427   :  { %3670 = vst [vmem:[#allocation21_spill] sm:$0xff] %v3194_v19  ;;  %3671 = vst [vmem:[#allocation22_spill] sm:$0xff] %v3197_v20 }
 0x428   :  { %1194 = vmatmul.mubr.f32.vlgmr.msra.gmra.mxu0 %v1124_v21  ;;  %1265 = vmatmul.mubr.f32.vlgmr.msra.gmra.mxu1 %v1124_v21  ;;  %v3200_v21 = vld [vmem:[#allocation3 + $0x18] sm:$0xff] }
 0x429   :  { %1304 = vmatpush1.msra.mxu0 %v2949_v45  ;;  %1375 = vmatpush1.msra.mxu1 %v2952_v3  ;;  %3672 = vst [vmem:[#allocation23_spill] sm:$0xff] %v3200_v21 }
 0x42a   :  { %1305 = vmatprep.subr.mxu0 %v2955_v2  ;;  %1376 = vmatprep.subr.mxu1 %v2958_v7 }
 0x42b   :  { %1306 = vmatpush1.msra.mxu0 %v2961_v60  ;;  %1377 = vmatpush1.msra.mxu1 %v2964_v63 }
 0x42c   :  { %1307 = vmatprep.subr.mxu0 %v2967_v1  ;;  %1378 = vmatprep.subr.mxu1 %v2970_v5 }
 0x42d   :  { %1308 = vmatpush1.msra.mxu0 %v2973_v62  ;;  %1379 = vmatpush1.msra.mxu1 %v2976_v59 }
 0x42e   :  { %1309 = vmatprep.subr.mxu0 %v2979_v4  ;;  %1380 = vmatprep.subr.mxu1 %v2982_v11 }
 0x42f   :  { %1310 = vmatpush1.msra.mxu0 %v2985_v10  ;;  %1381 = vmatpush1.msra.mxu1 %v2988_v18 }
 0x430   :  { %1311 = vmatprep.subr.mxu0 %v2991_v8  ;;  %1382 = vmatprep.subr.mxu1 %v2994_v34 }
 0x431   :  { %1312 = vmatpush1.msra.mxu0 %v3656_v22  ;;  %1383 = vmatpush1.msra.mxu1 %v3657_v23 }
 0x432   :  { %1313 = vmatprep.subr.mxu0 %v3003_v38  ;;  %1384 = vmatprep.subr.mxu1 %v3006_v54 }
 0x433   :  { %1314 = vmatpush1.msra.mxu0 %v3009_v0  ;;  %1385 = vmatpush1.msra.mxu1 %v3012_v61 }
 0x434   :  { %1315 = vmatprep.subr.mxu0 %v3015_v35  ;;  %1386 = vmatprep.subr.mxu1 %v3018_v37 }
 0x435   :  { %1316 = vmatpush1.msra.mxu0 %v3095_v24  ;;  %1387 = vmatpush1.msra.mxu1 %v3098_v25 }
 0x436   :  { %1317 = vmatprep.subr.mxu0 %v3101_v26  ;;  %1388 = vmatprep.subr.mxu1 %v3104_v28 }
 0x437   :  { %1318 = vmatpush1.msra.mxu0 %v3107_v29  ;;  %1389 = vmatpush1.msra.mxu1 %v3110_v31 }
 0x438   :  { %1319 = vmatprep.subr.mxu0 %v3113_v9  ;;  %1390 = vmatprep.subr.mxu1 %v3116_v39 }
 0x439   :  { %1320 = vmatpush1.msra.mxu0 %v3119_v40  ;;  %1391 = vmatpush1.msra.mxu1 %v3122_v41 }
 0x43a   :  { %1321 = vmatprep.subr.mxu0 %v3125_v42  ;;  %1392 = vmatprep.subr.mxu1 %v3128_v43 }
 0x43b   :  { %1322 = vmatpush1.msra.mxu0 %v3131_v44  ;;  %1393 = vmatpush1.msra.mxu1 %v3134_v46 }
 0x43c   :  { %1323 = vmatprep.subr.mxu0 %v3137_v47  ;;  %1394 = vmatprep.subr.mxu1 %v3140_v48 }
 0x43d   :  { %1324 = vmatpush1.msra.mxu0 %v3143_v49  ;;  %1395 = vmatpush1.msra.mxu1 %v3146_v50 }
 0x43e   :  { %1325 = vmatprep.subr.mxu0 %v3149_v51  ;;  %1396 = vmatprep.subr.mxu1 %v3152_v52 }
 0x43f   :  { %1326 = vmatpush1.msra.mxu0 %v3155_v53  ;;  %1397 = vmatpush1.msra.mxu1 %v3158_v55 }
 0x440   :  { %1327 = vmatprep.subr.mxu0 %v3161_v56  ;;  %1398 = vmatprep.subr.mxu1 %v3164_v57  ;;  %v3678_v57 = vld [vmem:[#allocation44_spill] sm:$0xff] }
 0x441   :  { %1328 = vmatpush1.msra.mxu0 %v3167_v58  ;;  %1399 = vmatpush1.msra.mxu1 %v3170_v27  ;;  %v3677_v58 = vld [vmem:[#allocation46_spill] sm:$0xff] }
 0x442   :  { %1329 = vmatprep.subr.mxu0 %v3173_v6  ;;  %1400 = vmatprep.subr.mxu1 %v3176_v36 }
 0x443   :  { %1330 = vmatpush1.msra.mxu0 %v3179_v12  ;;  %1401 = vmatpush1.msra.mxu1 %v3182_v13  ;;  %v3676_v12 = vld [vmem:[#allocation45_spill] sm:$0xff] }
 0x444   :  { %1331 = vmatprep.subr.mxu0 %v3185_v14  ;;  %1402 = vmatprep.subr.mxu1 %v3188_v15  ;;  %v3203_v14 = vld [vmem:[#allocation3] sm:$0xff]  ;;  %v3207_v15 = vld [vmem:[#allocation3 + $0x10] sm:$0xff] }
 0x445   :  { %1332 = vmatpush1.msra.mxu0 %v3191_v16  ;;  %1403 = vmatpush1.msra.mxu1 %v3194_v19  ;;  %3673 = vst [vmem:[#allocation24_spill] sm:$0xff] %v3203_v14  ;;  %3674 = vst [vmem:[#allocation25_spill] sm:$0xff] %v3207_v15  ;;  %v3675_v19 = vld [vmem:[#allocation43_spill] sm:$0xff] }
 0x446   :  { %1333 = vmatprep.subr.mxu0 %v3197_v20  ;;  %1404 = vmatprep.subr.mxu1 %v3200_v21 }
 0x447   :  { %1334 = vmatpush1.msra.mxu0 %v3203_v14  ;;  %1367 = vmatprep.mubr.f32.mxu0 %v3642_v30 }
 0x448   :  { %1405 = vmatpush1.msra.mxu1 %v3207_v15  ;;  %1438 = vmatprep.mubr.f32.mxu1 %v3642_v30 }
 0x449   :  { %1477 = vmatprep.subr.mxu0 %v2935_v32  ;;  %1548 = vmatprep.subr.mxu1 %v2938_v33 }
 0x4e8   :  { %v1195_v20 = vpop.f32.mrf.mxu0  ;;  %v1266_v14 = vpop.f32.mrf.mxu1 }
 0x4e9   :  { %v1271_v16 = vadd.f32 %v1195_v20, %v3675_v19  ;;  %v1273_v30 = vadd.f32 %v1266_v14, %v3678_v57  ;;  %v3684_v14 = vld [vmem:[#allocation14_spill] sm:$0xff] }
 0x4ea   :  { %v1197_v21 = vpop.f32.mrf.mxu0  ;;  %v1268_v27 = vpop.f32.mrf.mxu1 }
 0x4eb   :  { %v1986_v13 = vmul.f32 -1.442695, %v1271_v16  ;;  %v1272_v36 = vadd.f32 %v1197_v21, %v3676_v12  ;;  %v1274_v15 = vadd.f32 %v1268_v27, %v3677_v58  ;;  %v3683_v27 = vld [vmem:[#allocation32_spill] sm:$0xff] }
 0x4ed   :  { %2128 = vpow2.f32 %v1986_v13  ;;  %v1987_v6 = vmul.f32 -1.442695, %v1272_v36  ;;  %v1988_v56 = vmul.f32 -1.442695, %v1274_v15  ;;  %v3685_v15 = vld [vmem:[#allocation15_spill] sm:$0xff] }
 0x4ef   :  { %2130 = vpow2.f32 %v1987_v6 }
 0x4f0   :  { %2132 = vtanh.f32 %v1273_v30 }
 0x4f1   :  { %2134 = vpow2.f32 %v1988_v56  ;;  %v3682_v56 = vld [vmem:[#allocation34_spill] sm:$0xff] }
 0x4fa   :  { %v2129_v32 = vpop.eup %2128 }
 0x4fb   :  { %v1278_v55 = vadd.f32 1.0, %v2129_v32 }
 0x4fc   :  { %v2131_v33 = vpop.eup %2130 }
 0x4fd   :  { %2136 = vrcp.f32 %v1278_v55  ;;  %v1284_v19 = vadd.f32 1.0, %v2131_v33  ;;  %v2133_v16 = vpop.eup %2132  ;;  %v3679_v33 = vld [vmem:[#allocation10_spill] sm:$0xff]  ;;  %v3681_v55 = vld [vmem:[#allocation33_spill] sm:$0xff] }
 0x4fe   :  { %v2135_v12 = vpop.eup %2134 }
 0x4ff   :  { %2138 = vrcp.f32 %v1284_v19  ;;  %v1291_v6 = vadd.f32 1.0, %v2135_v12  ;;  %v3686_v19 = vld [vmem:[#allocation16_spill] sm:$0xff]  ;;  %v3688_v12 = vld [vmem:[#allocation18_spill] sm:$0xff] }
 0x501   :  { %2140 = vrcp.f32 %v1291_v6  ;;  %v3692_v6 = vld [vmem:[#allocation22_spill] sm:$0xff] }
 0x50a   :  { %v2137_v13 = vpop.eup %2136 }
 0x50b   :  { %v1295_v20 = vmul.f32 %v2137_v13, %v2133_v16  ;;  %v3687_v16 = vld [vmem:[#allocation17_spill] sm:$0xff]  ;;  %v3689_v13 = vld [vmem:[#allocation19_spill] sm:$0xff] }
 0x50c   :  { %v2139_v36 = vpop.eup %2138 }
 0x50d   :  { %v1294_v21 = vmul.f32 %v2139_v36, %v3068_v17  ;;  %v3680_v17 = vld [vmem:[#allocation31_spill] sm:$0xff]  ;;  %v3691_v36 = vld [vmem:[#allocation21_spill] sm:$0xff] }
 0x50e   :  { %v2141_v32 = vpop.eup %2140 }
 0x50f   :  { %v3218_v58 = vadd.f32 %v1295_v20, %v1294_v21  ;;  %v3690_v20 = vld [vmem:[#allocation20_spill] sm:$0xff]  ;;  %v3693_v21 = vld [vmem:[#allocation23_spill] sm:$0xff] }
 0x511   :  { %2142 = vtanh.f32 %v3218_v58 }
 0x51e   :  { %v2143_v30 = vpop.eup %2142 }
 0x51f   :  { %v1298_v57 = vmul.f32 %v2143_v30, %v2141_v32  ;;  %v3694_v32 = vld [vmem:[#allocation24_spill] sm:$0xff]  ;;  %v3695_v30 = vmov 0.0  }
 0x521   :  { %1368 = vmatmul.mubr.f32.vlgmr.msra.gmra.mxu0 %v1298_v57  ;;  %1439 = vmatmul.mubr.f32.vlgmr.msra.gmra.mxu1 %v1298_v57  ;;  %v3696_v57 = vld [vmem:[#allocation25_spill] sm:$0xff] }
 0x522   :  { %1478 = vmatpush1.msra.mxu0 %v2949_v45  ;;  %1549 = vmatpush1.msra.mxu1 %v2952_v3 }
 0x523   :  { %1479 = vmatprep.subr.mxu0 %v2955_v2  ;;  %1550 = vmatprep.subr.mxu1 %v2958_v7 }
 0x524   :  { %1480 = vmatpush1.msra.mxu0 %v2961_v60  ;;  %1551 = vmatpush1.msra.mxu1 %v2964_v63 }
 0x525   :  { %1481 = vmatprep.subr.mxu0 %v2967_v1  ;;  %1552 = vmatprep.subr.mxu1 %v2970_v5 }
 0x526   :  { %1482 = vmatpush1.msra.mxu0 %v2973_v62  ;;  %1553 = vmatpush1.msra.mxu1 %v2976_v59 }
 0x527   :  { %1483 = vmatprep.subr.mxu0 %v2979_v4  ;;  %1554 = vmatprep.subr.mxu1 %v2982_v11 }
 0x528   :  { %1484 = vmatpush1.msra.mxu0 %v2985_v10  ;;  %1555 = vmatpush1.msra.mxu1 %v2988_v18 }
 0x529   :  { %1485 = vmatprep.subr.mxu0 %v2991_v8  ;;  %1556 = vmatprep.subr.mxu1 %v2994_v34 }
 0x52a   :  { %1486 = vmatpush1.msra.mxu0 %v3656_v22  ;;  %1557 = vmatpush1.msra.mxu1 %v3657_v23 }
 0x52b   :  { %1487 = vmatprep.subr.mxu0 %v3003_v38  ;;  %1558 = vmatprep.subr.mxu1 %v3006_v54 }
 0x52c   :  { %1488 = vmatpush1.msra.mxu0 %v3009_v0  ;;  %1559 = vmatpush1.msra.mxu1 %v3012_v61 }
 0x52d   :  { %1489 = vmatprep.subr.mxu0 %v3015_v35  ;;  %1560 = vmatprep.subr.mxu1 %v3018_v37 }
 0x52e   :  { %1490 = vmatpush1.msra.mxu0 %v3095_v24  ;;  %1561 = vmatpush1.msra.mxu1 %v3098_v25 }
 0x52f   :  { %1491 = vmatprep.subr.mxu0 %v3101_v26  ;;  %1562 = vmatprep.subr.mxu1 %v3104_v28 }
 0x530   :  { %1492 = vmatpush1.msra.mxu0 %v3107_v29  ;;  %1563 = vmatpush1.msra.mxu1 %v3110_v31 }
 0x531   :  { %1493 = vmatprep.subr.mxu0 %v3113_v9  ;;  %1564 = vmatprep.subr.mxu1 %v3116_v39 }
 0x532   :  { %1494 = vmatpush1.msra.mxu0 %v3119_v40  ;;  %1565 = vmatpush1.msra.mxu1 %v3122_v41 }
 0x533   :  { %1495 = vmatprep.subr.mxu0 %v3125_v42  ;;  %1566 = vmatprep.subr.mxu1 %v3128_v43 }
 0x534   :  { %1496 = vmatpush1.msra.mxu0 %v3131_v44  ;;  %1567 = vmatpush1.msra.mxu1 %v3134_v46 }
 0x535   :  { %1497 = vmatprep.subr.mxu0 %v3137_v47  ;;  %1568 = vmatprep.subr.mxu1 %v3140_v48 }
 0x536   :  { %1498 = vmatpush1.msra.mxu0 %v3143_v49  ;;  %1569 = vmatpush1.msra.mxu1 %v3146_v50 }
 0x537   :  { %1499 = vmatprep.subr.mxu0 %v3149_v51  ;;  %1570 = vmatprep.subr.mxu1 %v3152_v52 }
 0x538   :  { %1500 = vmatpush1.msra.mxu0 %v3155_v53  ;;  %1571 = vmatpush1.msra.mxu1 %v3679_v33 }
 0x539   :  { %1501 = vmatprep.subr.mxu0 %v3680_v17  ;;  %1572 = vmatprep.subr.mxu1 %v3681_v55  ;;  %v3702_v55 = vld [vmem:[#allocation48_spill] sm:$0xff] }
 0x53a   :  { %1502 = vmatpush1.msra.mxu0 %v3682_v56  ;;  %1573 = vmatpush1.msra.mxu1 %v3683_v27  ;;  %v3701_v56 = vld [vmem:[#allocation50_spill] sm:$0xff] }
 0x53b   :  { %1503 = vmatprep.subr.mxu0 %v3684_v14  ;;  %1574 = vmatprep.subr.mxu1 %v3685_v15 }
 0x53c   :  { %1504 = vmatpush1.msra.mxu0 %v3686_v19  ;;  %1575 = vmatpush1.msra.mxu1 %v3687_v16  ;;  %v3697_v16 = vld [vmem:[#allocation11_spill] sm:$0xff] }
 0x53d   :  { %1505 = vmatprep.subr.mxu0 %v3688_v12  ;;  %1576 = vmatprep.subr.mxu1 %v3689_v13  ;;  %v3698_v12 = vld [vmem:[#allocation12_spill] sm:$0xff] }
 0x53e   :  { %1506 = vmatpush1.msra.mxu0 %v3690_v20  ;;  %1577 = vmatpush1.msra.mxu1 %v3691_v36  ;;  %v3699_v20 = vld [vmem:[#allocation47_spill] sm:$0xff] }
 0x53f   :  { %1507 = vmatprep.subr.mxu0 %v3692_v6  ;;  %1578 = vmatprep.subr.mxu1 %v3693_v21  ;;  %v3700_v6 = vld [vmem:[#allocation49_spill] sm:$0xff] }
 0x540   :  { %1508 = vmatpush1.msra.mxu0 %v3694_v32  ;;  %1541 = vmatprep.mubr.f32.mxu0 %v3695_v30 }
 0x541   :  { %1579 = vmatpush1.msra.mxu1 %v3696_v57  ;;  %1612 = vmatprep.mubr.f32.mxu1 %v3695_v30 }
 0x542   :  { %1651 = vmatprep.subr.mxu0 %v3697_v16  ;;  %1722 = vmatprep.subr.mxu1 %v3698_v12 }
 0x5e1   :  { %v1369_v13 = vpop.f32.mrf.mxu0  ;;  %v1440_v21 = vpop.f32.mrf.mxu1 }
 0x5e2   :  { %v1445_v19 = vadd.f32 %v1369_v13, %v3699_v20  ;;  %v1447_v30 = vadd.f32 %v1440_v21, %v3702_v55 }
 0x5e3   :  { %v1371_v36 = vpop.f32.mrf.mxu0  ;;  %v1442_v27 = vpop.f32.mrf.mxu1 }
 0x5e4   :  { %v1989_v15 = vmul.f32 -1.442695, %v1445_v19  ;;  %v1446_v14 = vadd.f32 %v1371_v36, %v3700_v6  ;;  %v1448_v57 = vadd.f32 %v1442_v27, %v3701_v56 }
 0x5e6   :  { %2144 = vpow2.f32 %v1989_v15  ;;  %v1990_v32 = vmul.f32 -1.442695, %v1446_v14  ;;  %v1991_v17 = vmul.f32 -1.442695, %v1448_v57 }
 0x5e8   :  { %2146 = vpow2.f32 %v1990_v32 }
 0x5e9   :  { %2148 = vtanh.f32 %v1447_v30 }
 0x5ea   :  { %2150 = vpow2.f32 %v1991_v17 }
 0x5f3   :  { %v2145_v16 = vpop.eup %2144 }
 0x5f4   :  { %v1452_v33 = vadd.f32 1.0, %v2145_v16  ;;  %v1843_v16 = vld [vmem:[%s3455_s5 + $0x78] sm:$0xff] }
 0x5f5   :  { %v2147_v12 = vpop.eup %2146 }
 0x5f6   :  { %2152 = vrcp.f32 %v1452_v33  ;;  %v1458_v13 = vadd.f32 1.0, %v2147_v12  ;;  %v2149_v19 = vpop.eup %2148  ;;  %v1842_v12 = vld [vmem:[%s3455_s5 + $0x70] sm:$0xff] }
 0x5f7   :  { %v2151_v20 = vpop.eup %2150 }
 0x5f8   :  { %2154 = vrcp.f32 %v1458_v13  ;;  %v1465_v6 = vadd.f32 1.0, %v2151_v20  ;;  %v1841_v13 = vld [vmem:[%s3455_s5 + $0x68] sm:$0xff]  ;;  %v1839_v20 = vld [vmem:[%s3455_s5 + $0x58] sm:$0xff] }
 0x5fa   :  { %2156 = vrcp.f32 %v1465_v6  ;;  %v1835_v6 = vld [vmem:[%s3455_s5 + $0x38] sm:$0xff] }
 0x603   :  { %v2153_v15 = vpop.eup %2152 }
 0x604   :  { %v1469_v36 = vmul.f32 %v2153_v15, %v2149_v19  ;;  %v1840_v19 = vld [vmem:[%s3455_s5 + $0x60] sm:$0xff]  ;;  %v1838_v15 = vld [vmem:[%s3455_s5 + $0x50] sm:$0xff] }
 0x605   :  { %v2155_v14 = vpop.eup %2154 }
 0x606   :  { %v1468_v32 = vmul.f32 %v2155_v14, %v3218_v58  ;;  %v1836_v14 = vld [vmem:[%s3455_s5 + $0x40] sm:$0xff] }
 0x607   :  { %v2157_v55 = vpop.eup %2156 }
 0x608   :  { %v3292_v56 = vadd.f32 %v1469_v36, %v1468_v32  ;;  %v1837_v36 = vld [vmem:[%s3455_s5 + $0x48] sm:$0xff]  ;;  %v1834_v32 = vld [vmem:[%s3455_s5 + $0x30] sm:$0xff] }
 0x60a   :  { %2158 = vtanh.f32 %v3292_v56 }
 0x617   :  { %v2159_v27 = vpop.eup %2158 }
 0x618   :  { %v1472_v21 = vmul.f32 %v2159_v27, %v2157_v55  ;;  %v1832_v55 = vld [vmem:[%s3455_s5 + $0x20] sm:$0xff]  ;;  %v1831_v27 = vld [vmem:[%s3455_s5 + $0x18] sm:$0xff] }
 0x61a   :  { %1542 = vmatmul.mubr.f32.vlgmr.msra.gmra.mxu0 %v1472_v21  ;;  %1613 = vmatmul.mubr.f32.vlgmr.msra.gmra.mxu1 %v1472_v21  ;;  %v1830_v21 = vld [vmem:[%s3455_s5 + $0x10] sm:$0xff] }
 0x61b   :  { %1652 = vmatpush1.msra.mxu0 %v2949_v45  ;;  %1723 = vmatpush1.msra.mxu1 %v2952_v3  ;;  %v3703_v45 = vld [vmem:[#allocation10_spill] sm:$0xff]  ;;  %v3704_v3 = vld [vmem:[#allocation31_spill] sm:$0xff] }
 0x61c   :  { %1653 = vmatprep.subr.mxu0 %v2955_v2  ;;  %1724 = vmatprep.subr.mxu1 %v2958_v7  ;;  %v3705_v2 = vld [vmem:[#allocation33_spill] sm:$0xff]  ;;  %v3706_v7 = vld [vmem:[#allocation34_spill] sm:$0xff] }
 0x61d   :  { %1654 = vmatpush1.msra.mxu0 %v2961_v60  ;;  %1725 = vmatpush1.msra.mxu1 %v2964_v63  ;;  %v3707_v60 = vld [vmem:[#allocation32_spill] sm:$0xff]  ;;  %v3708_v63 = vld [vmem:[#allocation14_spill] sm:$0xff] }
 0x61e   :  { %1655 = vmatprep.subr.mxu0 %v2967_v1  ;;  %1726 = vmatprep.subr.mxu1 %v2970_v5  ;;  %v3709_v1 = vld [vmem:[#allocation15_spill] sm:$0xff]  ;;  %v3710_v5 = vld [vmem:[#allocation16_spill] sm:$0xff] }
 0x61f   :  { %1656 = vmatpush1.msra.mxu0 %v2973_v62  ;;  %1727 = vmatpush1.msra.mxu1 %v2976_v59  ;;  %v3711_v62 = vld [vmem:[#allocation17_spill] sm:$0xff]  ;;  %v3712_v59 = vld [vmem:[#allocation18_spill] sm:$0xff] }
 0x620   :  { %1657 = vmatprep.subr.mxu0 %v2979_v4  ;;  %1728 = vmatprep.subr.mxu1 %v2982_v11  ;;  %v3713_v4 = vld [vmem:[#allocation19_spill] sm:$0xff]  ;;  %v3714_v11 = vld [vmem:[#allocation20_spill] sm:$0xff] }
 0x621   :  { %1658 = vmatpush1.msra.mxu0 %v2985_v10  ;;  %1729 = vmatpush1.msra.mxu1 %v2988_v18  ;;  %v3715_v10 = vld [vmem:[#allocation21_spill] sm:$0xff]  ;;  %v3716_v18 = vld [vmem:[#allocation22_spill] sm:$0xff] }
 0x622   :  { %1659 = vmatprep.subr.mxu0 %v2991_v8  ;;  %1730 = vmatprep.subr.mxu1 %v2994_v34  ;;  %v3717_v8 = vld [vmem:[#allocation23_spill] sm:$0xff]  ;;  %v3718_v34 = vld [vmem:[#allocation24_spill] sm:$0xff] }
 0x623   :  { %1660 = vmatpush1.msra.mxu0 %v3656_v22  ;;  %1731 = vmatpush1.msra.mxu1 %v3657_v23 }
 0x624   :  { %1661 = vmatprep.subr.mxu0 %v3003_v38  ;;  %1732 = vmatprep.subr.mxu1 %v3006_v54  ;;  %v1821_v38 = vld [vmem:[%s3451_s1] sm:$0xff]  ;;  %v2306_v54 = vmov 0  }
 0x625   :  { %1662 = vmatpush1.msra.mxu0 %v3009_v0  ;;  %1733 = vmatpush1.msra.mxu1 %v3012_v61  ;;  %v3721_v61 = vld [vmem:[#allocation51_spill] sm:$0xff] }
 0x626   :  { %1663 = vmatprep.subr.mxu0 %v3015_v35  ;;  %1734 = vmatprep.subr.mxu1 %v3018_v37  ;;  %v3719_v35 = vmov 0.0   ;;  %v3720_v37 = vld [vmem:[#allocation25_spill] sm:$0xff] }
 0x627   :  { %1664 = vmatpush1.msra.mxu0 %v3095_v24  ;;  %1735 = vmatpush1.msra.mxu1 %v3098_v25  ;;  %v3722_v25 = vld [vmem:[#allocation53_spill] sm:$0xff] }
 0x628   :  { %1665 = vmatprep.subr.mxu0 %v3101_v26  ;;  %1736 = vmatprep.subr.mxu1 %v3104_v28 }
 0x629   :  { %1666 = vmatpush1.msra.mxu0 %v3107_v29  ;;  %1737 = vmatpush1.msra.mxu1 %v3110_v31 }
 0x62a   :  { %1667 = vmatprep.subr.mxu0 %v3113_v9  ;;  %1738 = vmatprep.subr.mxu1 %v3116_v39  ;;  %v3723_v9 = vld [vmem:[#allocation54_spill] sm:$0xff] }
 0x62b   :  { %1668 = vmatpush1.msra.mxu0 %v3119_v40  ;;  %1739 = vmatpush1.msra.mxu1 %v3122_v41  ;;  %v3724_v40 = vld [vmem:[#allocation52_spill] sm:$0xff] }
 0x62c   :  { %1669 = vmatprep.subr.mxu0 %v3125_v42  ;;  %1740 = vmatprep.subr.mxu1 %v3128_v43 }
 0x62d   :  { %1670 = vmatpush1.msra.mxu0 %v3131_v44  ;;  %1741 = vmatpush1.msra.mxu1 %v3134_v46 }
 0x62e   :  { %1671 = vmatprep.subr.mxu0 %v3137_v47  ;;  %1742 = vmatprep.subr.mxu1 %v3140_v48 }
 0x62f   :  { %1672 = vmatpush1.msra.mxu0 %v3143_v49  ;;  %1743 = vmatpush1.msra.mxu1 %v3146_v50 }
 0x630   :  { %1673 = vmatprep.subr.mxu0 %v3149_v51  ;;  %1744 = vmatprep.subr.mxu1 %v3152_v52 }
 0x631   :  { %1674 = vmatpush1.msra.mxu0 %v3155_v53  ;;  %1745 = vmatpush1.msra.mxu1 %v3703_v45  ;;  %v1829_v45 = vld [vmem:[%s3455_s5 + $0x8] sm:$0xff] }
 0x632   :  { %1675 = vmatprep.subr.mxu0 %v3704_v3  ;;  %1746 = vmatprep.subr.mxu1 %v3705_v2  ;;  %v1828_v3 = vld [vmem:[%s3455_s5] sm:$0xff] }
 0x633   :  { %1676 = vmatpush1.msra.mxu0 %v3706_v7  ;;  %1747 = vmatpush1.msra.mxu1 %v3707_v60  ;;  %v3725_v7 = vld [vmem:[#allocation55_spill] sm:$0xff] }
 0x634   :  { %1677 = vmatprep.subr.mxu0 %v3708_v63  ;;  %1748 = vmatprep.subr.mxu1 %v3709_v1 }
 0x635   :  { %1678 = vmatpush1.msra.mxu0 %v3710_v5  ;;  %1749 = vmatpush1.msra.mxu1 %v3711_v62  ;;  %v3726_v5 = vld [vmem:[#allocation57_spill] sm:$0xff] }
 0x636   :  { %1679 = vmatprep.subr.mxu0 %v3712_v59  ;;  %1750 = vmatprep.subr.mxu1 %v3713_v4 }
 0x637   :  { %1680 = vmatpush1.msra.mxu0 %v3714_v11  ;;  %1751 = vmatpush1.msra.mxu1 %v3715_v10  ;;  %v3727_v10 = vld [vmem:[#allocation58_spill] sm:$0xff] }
 0x638   :  { %1681 = vmatprep.subr.mxu0 %v3716_v18  ;;  %1752 = vmatprep.subr.mxu1 %v3717_v8  ;;  %v3728_v8 = vld [vmem:[#allocation56_spill] sm:$0xff] }
 0x639   :  { %1682 = vmatpush1.msra.mxu0 %v3718_v34  ;;  %1715 = vmatprep.mubr.f32.mxu0 %v3719_v35 }
 0x63a   :  { %1753 = vmatpush1.msra.mxu1 %v3720_v37  ;;  %1786 = vmatprep.mubr.f32.mxu1 %v3719_v35 }
 0x63b   :  { %2017 = vmatprep.subr.mxu0 %v3719_v35  ;;  %2061 = vset.pattern.permute.xlu0 %v2306_v54 }
 0x63c   :  { %1824 = vperm.xlu0 %2061, %v1821_v38  }
 0x6da   :  { %v1543_v0 = vpop.f32.mrf.mxu0  ;;  %v1614_v28 = vpop.f32.mrf.mxu1 }
 0x6db   :  { %v1619_v22 = vadd.f32 %v1543_v0, %v3721_v61  ;;  %v1621_v41 = vadd.f32 %v1614_v28, %v3724_v40 }
 0x6dc   :  { %v1545_v23 = vpop.f32.mrf.mxu0  ;;  %v1616_v31 = vpop.f32.mrf.mxu1 }
 0x6dd   :  { %v1992_v24 = vmul.f32 -1.442695, %v1619_v22  ;;  %v1620_v26 = vadd.f32 %v1545_v23, %v3722_v25  ;;  %v1622_v39 = vadd.f32 %v1616_v31, %v3723_v9 }
 0x6df   :  { %2160 = vpow2.f32 %v1992_v24  ;;  %v1993_v29 = vmul.f32 -1.442695, %v1620_v26  ;;  %v1994_v42 = vmul.f32 -1.442695, %v1622_v39  ;;  %v1825_v39 = vpop.permute.xlu0 %1824 }
 0x6e1   :  { %2162 = vpow2.f32 %v1993_v29 }
 0x6e2   :  { %2164 = vtanh.f32 %v1621_v41 }
 0x6e3   :  { %2166 = vpow2.f32 %v1994_v42  ;;  %v1998_v42 = vld [vmem:[%s3456_s6] ss:$0 sm:$0xff]  ;;  %s2310_s6 = smov [#allocation6]  }
 0x6e4   :  { %s1949_s2 = sshll.u32 %s2310_s6, 4  ;;  %s1950_s2 = int_to_ptr.vmem [resolvable:$true] %s1949_s2 }
 0x6e5   :  { %s2278_s29 = scalar_lea.vmem %s1950_s2, 128  ;;  %p2283_p6 = scmp.lt.s32.totalorder %s1950_s2, %s1950_s2 }
 0x6e6   :  { %p2279_p5 = scmp.ne.s32.totalorder %s1950_s2, %s2278_s29  ;;  %p2284_p7 = scmp.lt.s32.totalorder %s2278_s29, %s2278_s29 }
 0x6e8   :  { %p2285_p8 = por %p2284_p7, %p2283_p6 }
 0x6ea   :  { %p2286_p9 = pnand %p2285_p8, %p2279_p5 }
 0x6ec   :  { %v2161_v43 = vpop.eup %2160 }
 0x6ed   :  { %v1626_v44 = vadd.f32 1.0, %v2161_v43 }
 0x6ee   :  { %v2163_v46 = vpop.eup %2162 }
 0x6ef   :  { %2168 = vrcp.f32 %v1626_v44  ;;  %v1632_v47 = vadd.f32 1.0, %v2163_v46  ;;  %v2165_v48 = vpop.eup %2164 }
 0x6f0   :  { %v2167_v49 = vpop.eup %2166 }
 0x6f1   :  { %2170 = vrcp.f32 %v1632_v47  ;;  %v1639_v53 = vadd.f32 1.0, %v2167_v49  ;;  %v2308_v47 = vmov 16  }
 0x6f2   :  { %2062 = vset.pattern.permute.xlu1 %v2308_v47  ;;  %2063 = vset.pattern.permute.xlu0 %v2308_v47 }
 0x6f3   :  { %2172 = vrcp.f32 %v1639_v53 }
 0x6fc   :  { %v2169_v50 = vpop.eup %2168 }
 0x6fd   :  { %v1643_v51 = vmul.f32 %v2169_v50, %v2165_v48 }
 0x6fe   :  { %v2171_v52 = vpop.eup %2170 }
 0x6ff   :  { %v1642_v58 = vmul.f32 %v2171_v52, %v3292_v56  ;;  %v1833_v56 = vld [vmem:[%s3455_s5 + $0x28] sm:$0xff]  ;;  %v1999_v52 = vld [vmem:[%s3457_s7] ss:$0 sm:$0xff] }
 0x700   :  { %v2173_v17 = vpop.eup %2172 }
 0x701   :  { %v3368_v33 = vadd.f32 %v1643_v51, %v1642_v58 }
 0x703   :  { %2174 = vtanh.f32 %v3368_v33 }
 0x710   :  { %v2175_v30 = vpop.eup %2174 }
 0x711   :  { %v1646_v57 = vmul.f32 %v2175_v30, %v2173_v17 }
 0x713   :  { %1716 = vmatmul.mubr.f32.vlgmr.msra.gmra.mxu0 %v1646_v57  ;;  %1787 = vmatmul.mubr.f32.vlgmr.msra.gmra.mxu1 %v1646_v57 }
 0x714   :  { %2018 = vmatpush3.msra.mxu0 %v1843_v16  ;;  %2049 = vmatprep.mubr.msk.f32.mxu0 %vm2307_vm1, %v3719_v35 }
 0x715   :  { %2019 = vmatprep.subr.mxu0 %v3719_v35 }
 0x716   :  { %2020 = vmatpush3.msra.mxu0 %v1842_v12 }
 0x717   :  { %2021 = vmatprep.subr.mxu0 %v3719_v35 }
 0x718   :  { %2022 = vmatpush3.msra.mxu0 %v1841_v13 }
 0x719   :  { %2023 = vmatprep.subr.mxu0 %v3719_v35 }
 0x71a   :  { %2024 = vmatpush3.msra.mxu0 %v1840_v19 }
 0x71b   :  { %2025 = vmatprep.subr.mxu0 %v3719_v35 }
 0x71c   :  { %2026 = vmatpush3.msra.mxu0 %v1839_v20 }
 0x71d   :  { %2027 = vmatprep.subr.mxu0 %v3719_v35 }
 0x71e   :  { %2028 = vmatpush3.msra.mxu0 %v1838_v15 }
 0x71f   :  { %2029 = vmatprep.subr.mxu0 %v3719_v35 }
 0x720   :  { %2030 = vmatpush3.msra.mxu0 %v1837_v36 }
 0x721   :  { %2031 = vmatprep.subr.mxu0 %v3719_v35 }
 0x722   :  { %2032 = vmatpush3.msra.mxu0 %v1836_v14 }
 0x723   :  { %2033 = vmatprep.subr.mxu0 %v3719_v35 }
 0x724   :  { %2034 = vmatpush3.msra.mxu0 %v1835_v6 }
 0x725   :  { %2035 = vmatprep.subr.mxu0 %v3719_v35 }
 0x726   :  { %2036 = vmatpush3.msra.mxu0 %v1834_v32 }
 0x727   :  { %2037 = vmatprep.subr.mxu0 %v3719_v35 }
 0x728   :  { %2038 = vmatpush3.msra.mxu0 %v1833_v56 }
 0x729   :  { %2039 = vmatprep.subr.mxu0 %v3719_v35 }
 0x72a   :  { %2040 = vmatpush3.msra.mxu0 %v1832_v55 }
 0x72b   :  { %2041 = vmatprep.subr.mxu0 %v3719_v35 }
 0x72c   :  { %2042 = vmatpush3.msra.mxu0 %v1831_v27 }
 0x72d   :  { %2043 = vmatprep.subr.mxu0 %v3719_v35 }
 0x72e   :  { %2044 = vmatpush3.msra.mxu0 %v1830_v21 }
 0x72f   :  { %2045 = vmatprep.subr.mxu0 %v3719_v35 }
 0x730   :  { %2046 = vmatpush3.msra.mxu0 %v1829_v45 }
 0x731   :  { %2047 = vmatprep.subr.mxu0 %v3719_v35 }
 0x732   :  { %2048 = vmatpush3.msra.mxu0 %v1828_v3 }
 0x7d3   :  { %v1717_v2 = vpop.f32.mrf.mxu0  ;;  %v1788_v59 = vpop.f32.mrf.mxu1 }
 0x7d4   :  { %v1793_v60 = vadd.f32 %v1717_v2, %v3725_v7  ;;  %v1795_v34 = vadd.f32 %v1788_v59, %v3728_v8 }
 0x7d5   :  { %v1719_v63 = vpop.f32.mrf.mxu0  ;;  %v1790_v11 = vpop.f32.mrf.mxu1 }
 0x7d6   :  { %v1995_v1 = vmul.f32 -1.442695, %v1793_v60  ;;  %v1794_v62 = vadd.f32 %v1719_v63, %v3726_v5  ;;  %v1796_v18 = vadd.f32 %v1790_v11, %v3727_v10 }
 0x7d8   :  { %2176 = vpow2.f32 %v1995_v1  ;;  %v1996_v4 = vmul.f32 -1.442695, %v1794_v62  ;;  %v1997_v37 = vmul.f32 -1.442695, %v1796_v18 }
 0x7da   :  { %2178 = vpow2.f32 %v1996_v4 }
 0x7db   :  { %2180 = vtanh.f32 %v1795_v34 }
 0x7dc   :  { %2182 = vpow2.f32 %v1997_v37 }
 0x7e5   :  { %v2177_v38 = vpop.eup %2176 }
 0x7e6   :  { %v1800_v35 = vadd.f32 1.0, %v2177_v38 }
 0x7e7   :  { %v2179_v54 = vpop.eup %2178 }
 0x7e8   :  { %2184 = vrcp.f32 %v1800_v35  ;;  %v1806_v0 = vadd.f32 1.0, %v2179_v54  ;;  %v2181_v61 = vpop.eup %2180 }
 0x7e9   :  { %v2183_v22 = vpop.eup %2182 }
 0x7ea   :  { %2186 = vrcp.f32 %v1806_v0  ;;  %v1813_v26 = vadd.f32 1.0, %v2183_v22 }
 0x7ec   :  { %2188 = vrcp.f32 %v1813_v26 }
 0x7f5   :  { %v2185_v23 = vpop.eup %2184 }
 0x7f6   :  { %v1817_v24 = vmul.f32 %v2185_v23, %v2181_v61 }
 0x7f7   :  { %v2187_v25 = vpop.eup %2186 }
 0x7f8   :  { %v1816_v28 = vmul.f32 %v2187_v25, %v3368_v33 }
 0x7f9   :  { %v2189_v31 = vpop.eup %2188 }
 0x7fa   :  { %v1818_v29 = vadd.f32 %v1817_v24, %v1816_v28 }
 0x7fc   :  { %2190 = vtanh.f32 %v1818_v29 }
 0x809   :  { %v2191_v9 = vpop.eup %2190 }
 0x80a   :  { %v1820_v40 = vmul.f32 %v2191_v9, %v2189_v31 }
 0x80c   :  { %v1827_v41 = vmul.f32 %v1825_v39, %v1820_v40 }
 0x80e   :  { %2050 = vmatmul.mubr.f32.vlgmr.msra.gmra.mxu0 %v1827_v41 }
 0x8ce   :  { %v1917_v43 = vpop.f32.mrf.mxu0 }
 0x8cf   :  { %v1918_v44 = vadd.f32 %v1998_v42, %v1917_v43 }
 0x8d0   :  { %v2051_v46 = vpop.f32.mrf.mxu0 }
 0x8d1   :  { %2192 = vtanh.f32 %v1918_v44 }
 0x8de   :  { %v2193_v48 = vpop.eup %2192 }
 0x8df   :  { %v1922_v49 = vsub.f32 %v1918_v44, %v2193_v48 }
 0x8e1   :  { %1924 = vrot.lane.b32.xlu0 %v1922_v49, %s2309_s26 }
 0x953   :  { %v1925_v50 = vpop.permute.xlu0 %1924 }
 0x954   :  { %v1927_v51 = vmul.f32 %v2193_v48, %v1925_v50 }
 0x956   :  { %1930 = vperm.xlu1 %2062, %v1927_v51  }
 0x9d1   :  { %v1931_v53 = vpop.permute.xlu1 %1930 }
 0x9d2   :  { %v1933_v58 = vmul.f32 %v1931_v53, %v1918_v44 }
 0x9d4   :  { %v1941_v33 = vadd.f32 %v1999_v52, %v1933_v58 }
 0x9d6   :  { %1942 = vst.msk [vmem:[#allocation6] sm:$0xff] %vm82_vm0, %v1941_v33 }
 0x9d7   :  { %2289 = shalt.err (!%p2286_p9)
}
 0x9d8   :  { %1952 = dma.vmem_to_hbm [thread:$0]  %s1950_s2, 128, %s3458_s8, [#allocation5]  }
 0x9d9   :  { %2300 = dma.done.wait [#allocation5], 128  }
 0x9da   :  { %2301 = vsyncadd [#allocation5], 4294967168 }
 0x9db   :  { %1956 = vsyncpa [#allocation4], 1 }
 0x9dc   :  { %1957 = vsyncpa [#allocation5], 1 }

</bundles_post_ra>
